<compile_context>
chip_gen: v5e
topology: v5e:2x2
jax: 0.10.0
libtpu: 0.0.40
codegen_flags: <defaults>
</compile_context>

<pallas_src>
import numpy as np
import jax
import jax.numpy as jnp
from jax.experimental import pallas as pl
from jax.experimental.pallas import tpu as pltpu

# ----------------------- small synthetic configuration -----------------------
B = 2          # batch
S = 16         # sequence length
CN = 8         # node_in_size == node_out_size  -> project_node = Identity
CE = 4         # edge_in_size == edge_out_size  -> project_edge = Identity
HEADS = 2      # attention heads
ATT = 8        # attention_size
VAL = 8        # value_size
AH = ATT * HEADS
VH = VAL * HEADS
N = B * S      # flattened node rows

WEIGHT_NAMES = [
    "W1", "b1", "W2", "b2",                # node_mlp (Conv1d k=1, with bias)
    "We1", "be1", "We2", "be2",            # edge_mlp (Conv2d k=1, with bias)
    "an0", "an1", "ae0", "ae1",            # ReZero alphas (per-channel)
    "Wq", "Wk_n", "Wk_e", "Wv_n", "Wv_e",  # attention projections (no bias)
    "Wout", "Weo_v", "Weo_e",              # out / edge_out projections (no bias)
]


# ------------------------- packed-slab static layout --------------------------
def _layout():
  blocks = [
      ("w1", CN, CN), ("w2", CN, CN),
      ("wqk", CN, 2 * AH), ("wvn", CN, VH),
      ("bdWe1", S * CE, S * CE), ("bdWe2", S * CE, S * CE), ("bdWeoe", S * CE, S * CE),
      ("hsel", AH, HEADS),
      ("wqe0", AH, S * CE), ("wqe1", AH, S * CE),
      ("psum", S * CE, S), ("texp", S, S * CE),
      ("wvert0", S * CE, VAL), ("wvert1", S * CE, VAL),
      ("woe0", VAL, CN + CE), ("woe1", VAL, CN + CE),
      ("ttile4", CE, S * CE), ("ttile8", CN, S * CN),
      ("rowsel4", N, S * CE), ("rowsel8", N, S * CN),
      ("ebt", B, N), ("eb", N, N), ("ebm", N, B), ("isel", N, S),
      ("vecs", 8, 128),
  ]
  lay, r = {}, 0
  for name, nr, nc in blocks:
    lay[name] = (r, nr, nc)
    r += -(-nr // 8) * 8          # every block starts on an 8-row (sublane) boundary
  return lay, -(-r // 8) * 8


LAYOUT, SLAB_ROWS = _layout()


def pack_params(params):
  """Assemble ALL weights + derived constants into one (SLAB_ROWS, 128) f32 slab.

  Pure host-side numpy; runs once at init (nothing here is traced per call)."""
  w = {k: np.asarray(v, np.float32) for k, v in params.items()}
  slab = np.zeros((SLAB_ROWS, 128), np.float32)

  def put(name, mat):
    r0, nr, nc = LAYOUT[name]
    mat = np.asarray(mat, np.float32)
    assert mat.shape == (nr, nc), (name, mat.shape, (nr, nc))
    slab[r0:r0 + nr, :nc] = mat

  # ---- plain weights (each matmul RHS starts at lane 0 of its own 8-row band) ----
  put("w1", w["W1"]); put("w2", w["W2"])
  put("wqk", np.concatenate([w["Wq"], w["Wk_n"]], axis=1))
  put("wvn", w["Wv_n"])

  # ---- block-diagonal edge 1x1 convs on the lane-dense (S*CE) slab ----
  def block_diag(m):
    out = np.zeros((S * CE, S * CE), np.float32)
    for j in range(S):
      out[j * CE:(j + 1) * CE, j * CE:(j + 1) * CE] = m
    return out

  put("bdWe1", block_diag(w["We1"]))
  put("bdWe2", block_diag(w["We2"]))
  put("bdWeoe", block_diag(w["Weo_e"]))

  # ---- attention helper matrices ----
  # hsel[d, h] = 1 if attention dim d belongs to head h  (for sum_d q*k_n per head)
  put("hsel", (np.arange(AH)[:, None] // ATT == np.arange(HEADS)[None, :]).astype(np.float32))
  # wqe_h[d, j*CE+c] = Wk_e[c, d] if d in head h else 0 ->  (q @ wqe_h)[n, j*CE+c]
  # equals sum_{d in head h} q[n,d] * Wk_e[c,d], replicated over j.
  for h in range(HEADS):
    wqe = np.zeros((AH, S * CE), np.float32)
    blk_h = w["Wk_e"][:, h * ATT:(h + 1) * ATT].T          # (ATT, CE)
    for j in range(S):
      wqe[h * ATT:(h + 1) * ATT, j * CE:(j + 1) * CE] = blk_h
    put(f"wqe{h}", wqe)
  # psum[j*CE+c, j'] = (j == j')   : sum over the CE channels of key block j
  psum = np.zeros((S * CE, S), np.float32)
  for j in range(S):
    psum[j * CE:(j + 1) * CE, j] = 1.0
  put("psum", psum)
  put("texp", psum.T.copy())                               # replicate (N,S) over CE lanes
  # wvert_h[j*CE+c, v] = Wv_e[c, h*VAL+v]  : folds the per-j value projection
  for h in range(HEADS):
    put(f"wvert{h}", np.tile(w["Wv_e"][:, h * VAL:(h + 1) * VAL], (S, 1)))
  # per-head rows of [Wout | Weo_v]
  woe = np.concatenate([w["Wout"], w["Weo_v"]], axis=1)    # (VH, CN+CE)
  for h in range(HEADS):
    put(f"woe{h}", woe[h * VAL:(h + 1) * VAL, :])

  # ---- replication / selection constants (make every layout change a matmul) ----
  t4 = np.zeros((CE, S * CE), np.float32)
  for j in range(S):
    t4[:, j * CE:(j + 1) * CE] = np.eye(CE)
  put("ttile4", t4)
  t8 = np.zeros((CN, S * CN), np.float32)
  for i in range(S):
    t8[:, i * CN:(i + 1) * CN] = np.eye(CN)
  put("ttile8", t8)
  i_of_n = np.arange(N) % S
  b_of_n = np.arange(N) // S
  rs4 = np.zeros((N, S * CE), np.float32)
  rs8 = np.zeros((N, S * CN), np.float32)
  for n in range(N):
    rs4[n, i_of_n[n] * CE:(i_of_n[n] + 1) * CE] = 1.0
    rs8[n, i_of_n[n] * CN:(i_of_n[n] + 1) * CN] = 1.0
  put("rowsel4", rs4); put("rowsel8", rs8)
  ebm = (b_of_n[:, None] == np.arange(B)[None, :]).astype(np.float32)
  put("ebm", ebm)
  put("ebt", ebm.T.copy())
  put("eb", (b_of_n[:, None] == b_of_n[None, :]).astype(np.float32))
  put("isel", (i_of_n[:, None] == np.arange(S)[None, :]).astype(np.float32))

  # ---- bias / ReZero row vectors (edge ones pre-tiled over the S*CE lanes) ----
  vecs = np.zeros((8, 128), np.float32)
  vecs[0, :CN] = w["b1"].reshape(-1)
  vecs[1, :CN] = w["b2"].reshape(-1)
  vecs[2, :CN] = w["an0"].reshape(-1)
  vecs[3, :CN] = w["an1"].reshape(-1)
  vecs[4, :S * CE] = np.tile(w["be1"].reshape(-1), S)
  vecs[5, :S * CE] = np.tile(w["be2"].reshape(-1), S)
  vecs[6, :S * CE] = np.tile(w["ae0"].reshape(-1), S)
  vecs[7, :S * CE] = np.tile(w["ae1"].reshape(-1), S)
  put("vecs", vecs)
  return jnp.asarray(slab)


# --------------------------------- kernel ------------------------------------
def mat_transformer_block_kernel(nodes_ref, edges_ref, mask_ref, wpack_ref,
                                 nodes_out_ref, edges_out_ref):
  """Whole batch in one invocation; only 2-D matmuls + elementwise ops, no reshapes."""
  f32 = jnp.float32

  def blk(name):
    r0, nr, nc = LAYOUT[name]
    return wpack_ref[r0:r0 + nr, 0:nc]          # static VMEM window load

  def vec(row, ncols):
    r0, _, _ = LAYOUT["vecs"]
    return wpack_ref[r0 + row:r0 + row + 1, 0:ncols]

  def dot(a, b):
    return jnp.dot(a, b, preferred_element_type=f32)

  # ---- masks, derived via baked selector matmuls (no reshapes/broadcast_to) ----
  m = mask_ref[...]                                        # (B, S)
  mk = dot(blk("ebm"), m)                                  # (N, S)  mk[n,j] = m[b(n), j]
  mq = jnp.sum(mk * blk("isel"), axis=1, keepdims=True)    # (N, 1)  m[b(n), i(n)]
  mm = mk * mq                                             # (N, S)
  neg_bias = (mk - 1.0) * 1e30                             # additive key mask (NaN-safe)

  # ---- node MLP (Conv1d-ReLU-Conv1d-ReLU) + ReZero; dropout = identity ----
  n0 = nodes_ref[...]                                      # (N, CN)
  h = jnp.maximum(dot(n0, blk("w1")) + vec(0, CN), 0.0)
  h = jnp.maximum(dot(h, blk("w2")) + vec(1, CN), 0.0)
  n1 = n0 + vec(2, CN) * h                                 # (N, CN)

  # ---- edge MLP + ReZero, fully lane-dense via block-diagonal 1x1 convs ----
  e0 = edges_ref[...]                                      # (N, S*CE)
  he = jnp.maximum(dot(e0, blk("bdWe1")) + vec(4, S * CE), 0.0)
  he = jnp.maximum(dot(he, blk("bdWe2")) + vec(5, S * CE), 0.0)
  e1 = e0 + vec(6, S * CE) * he                            # (N, S*CE)

  # ---- attention projections (k = k_n + k_e, v = v_n + v_e split) ----
  qk = dot(n1, blk("wqk"))                                 # (N, 2*AH) = [q | k_n]
  q, kn = qk[:, 0:AH], qk[:, AH:2 * AH]
  vn = dot(n1, blk("wvn"))                                 # (N, VH)
  s_node = dot(q * kn, blk("hsel"))                        # (N, HEADS): per-head q.k_n

  inv_sqrt_a = 1.0 / (float(ATT) ** 0.5)
  no_eo = jnp.zeros((N, CN + CE), f32)                     # accum of [Wout | Weo_v] proj

  for hd in range(HEADS):                                  # static 2-iteration loop
    # scores with the key axis S on lanes: s[n, j]
    qe = dot(q, blk(f"wqe{hd}"))                           # (N, S*CE)
    s = dot(e1 * qe, blk("psum"))                          # (N, S): sum_d q * k_e
    s = (s + s_node[:, hd:hd + 1]) * inv_sqrt_a + neg_bias
    s = s - jnp.max(s, axis=1, keepdims=True)
    p = jnp.exp(s)
    p = p * pl.reciprocal(jnp.sum(p, axis=1, keepdims=True), approx=True)
    pm = p * mm                                            # softmax * (m_i * m_j)
    # node features: sum_j pm * (v_n + v_e)
    nf = jnp.sum(pm, axis=1, keepdims=True) * vn[:, hd * VAL:(hd + 1) * VAL]
    pm_t = dot(pm, blk("texp"))                            # pm replicated over CE lanes
    nf = nf + dot(pm_t * e1, blk(f"wvert{hd}"))            # (N, VAL)
    no_eo = no_eo + dot(nf, blk(f"woe{hd}"))               # (N, CN+CE)

  node_att = no_eo[:, 0:CN]                                # == self.out(node_features)
  nfw = no_eo[:, CN:CN + CE]                               # node_features @ Weo_v

  # ---- node output: ReZero residual + mask, stored lane-dense as (B, S*CN) ----
  n_out = (n1 + vec(3, CN) * node_att) * mq                # (N, CN)
  y = dot(n_out, blk("ttile8")) * blk("rowsel8")           # scatter row n into i(n) block
  nodes_out_ref[...] = dot(blk("ebt"), y)                  # (B, S*CN)

  # ---- edge output: edge_out(concat((ef+ef^T)/2, edges1)) split linearly ----
  ew = dot(e1, blk("bdWeoe"))                              # edges1 @ Weo_e, (N, S*CE)
  nfw_i = dot(nfw, blk("ttile4"))                          # nfw[n,:] tiled over j
  nfw_j = dot(blk("eb"), nfw_i * blk("rowsel4"))           # nfw[(b(n), j), :] per lane blk
  edge_att = 0.5 * (nfw_i + nfw_j) + ew
  mm_d = dot(mm, blk("texp"))                              # mm[n,j] over CE lanes
  edges_out_ref[...] = (e1 + vec(7, S * CE) * edge_att) * mm_d


# --------------------------------- wrapper -----------------------------------
@jax.jit
def materialized_transformer_block(nodes, edges, mask, wpack):
  """nodes (B,S,CN) f32, edges (B,S,S,CE) f32, mask (B,S) f32 {0,1}, wpack packed slab."""
  nodes2d = nodes.reshape(N, CN)                 # free XLA reshapes (row-major flatten)
  edges2d = edges.reshape(N, S * CE)
  vmem = pl.BlockSpec(memory_space=pltpu.MemorySpace.VMEM)
  n_dense, e_dense = pl.pallas_call(
      mat_transformer_block_kernel,
      out_shape=(
          jax.ShapeDtypeStruct((B, S * CN), jnp.float32),
          jax.ShapeDtypeStruct((N, S * CE), jnp.float32),
      ),
      in_specs=[vmem, vmem, vmem, vmem],
      out_specs=(vmem, vmem),
  )(nodes2d, edges2d, mask, wpack)
  return n_dense.reshape(B, S, CN), e_dense.reshape(B, S, S, CE)


# ----------------------- deterministic parameter init ------------------------
def init_params(key):
  ks = jax.random.split(key, len(WEIGHT_NAMES))
  shapes = {
      "W1": (CN, CN), "b1": (1, CN), "W2": (CN, CN), "b2": (1, CN),
      "We1": (CE, CE), "be1": (1, CE), "We2": (CE, CE), "be2": (1, CE),
      "an0": (1, CN), "an1": (1, CN), "ae0": (1, CE), "ae1": (1, CE),
      "Wq": (CN, AH), "Wk_n": (CN, AH), "Wk_e": (CE, AH),
      "Wv_n": (CN, VH), "Wv_e": (CE, VH),
      "Wout": (VH, CN), "Weo_v": (VH, CE), "Weo_e": (CE, CE),
  }
  scales = {"b1": 0.05, "b2": 0.05, "be1": 0.05, "be2": 0.05,
            "an0": 0.2, "an1": 0.2, "ae0": 0.2, "ae1": 0.2}
  params = {}
  for k_name, k_rng in zip(WEIGHT_NAMES, ks):
    scale = scales.get(k_name, 0.15)
    params[k_name] = (scale * jax.random.normal(k_rng, shapes[k_name])).astype(jnp.float32)
  return params


# -------------------- pure-JAX reference in PyTorch NCHW layout --------------
def reference_nchw(nodes, edges, mask_bool, p):
  """Line-by-line port of the PyTorch forward (eval mode); NCHW layout."""
  hi = jax.lax.Precision.HIGHEST
  relu = lambda t: jnp.maximum(t, 0.0)

  def conv1d(x, W, b=None):            # W stored (in, out)
    y = jnp.einsum("io,bis->bos", W, x, precision=hi)
    return y if b is None else y + b.reshape(1, -1, 1)

  def conv2d(x, W, b=None):
    y = jnp.einsum("io,bisz->bosz", W, x, precision=hi)
    return y if b is None else y + b.reshape(1, -1, 1, 1)

  Bc = nodes.shape[0]
  Wk = jnp.concatenate([p["Wk_n"], p["Wk_e"]], axis=0)
  Wv = jnp.concatenate([p["Wv_n"], p["Wv_e"]], axis=0)
  Weo = jnp.concatenate([p["Weo_v"], p["Weo_e"]], axis=0)

  # block step 1: MLPs + ReZero (dropout identity)
  h = relu(conv1d(relu(conv1d(nodes, p["W1"], p["b1"])), p["W2"], p["b2"]))
  nodes1 = nodes + p["an0"].reshape(1, -1, 1) * h
  he = relu(conv2d(relu(conv2d(edges, p["We1"], p["be1"])), p["We2"], p["be2"]))
  edges1 = edges + p["ae0"].reshape(1, -1, 1, 1) * he

  # attention
  query = conv1d(nodes1, p["Wq"])[:, :, :, None]
  node_edges = jnp.concatenate(
      [jnp.broadcast_to(nodes1[:, :, :, None], (Bc, CN, S, S)), edges1], axis=1)
  key = conv2d(node_edges, Wk)
  value = conv2d(node_edges, Wv).reshape(Bc, HEADS, VAL, S, S)

  sim = (query * key).reshape(Bc, HEADS, ATT, S, S).sum(axis=2) / jnp.sqrt(jnp.float32(ATT))
  sim = jnp.where(mask_bool[:, None, None, :], sim, -jnp.inf)
  sim = jax.nn.softmax(sim, axis=-1)
  mm = (mask_bool[:, None, None, :] & mask_bool[:, None, :, None]).astype(jnp.float32)
  sim = sim * mm
  value = value * mm[:, None]
  node_features = (sim[:, :, None] * value).sum(axis=-1)               # (B,H,V,S)
  node_att = conv1d(node_features.reshape(Bc, VH, S), p["Wout"])
  ef = jnp.broadcast_to(node_features[..., None], (Bc, HEADS, VAL, S, S)).reshape(Bc, VH, S, S)
  ef_sym = 0.5 * (ef + jnp.swapaxes(ef, -1, -2))
  edge_att = conv2d(jnp.concatenate([ef_sym, edges1], axis=1), Weo)

  # block step 2: residuals + final masking
  nodes_out = nodes1 + p["an1"].reshape(1, -1, 1) * node_att
  edges_out = edges1 + p["ae1"].reshape(1, -1, 1, 1) * edge_att
  nodes_out = nodes_out * mask_bool[:, None, :].astype(jnp.float32)
  edges_out = edges_out * mm
  return nodes_out, edges_out


# ----------------------------------- main -------------------------------------
if __name__ == "__main__":
  key = jax.random.PRNGKey(0)
  k_nodes, k_edges, k_params = jax.random.split(key, 3)

  nodes = jax.random.normal(k_nodes, (B, S, CN), dtype=jnp.float32)
  edges = jax.random.normal(k_edges, (B, S, S, CE), dtype=jnp.float32)
  mask_bool = jnp.ones((B, S), dtype=bool).at[0, -3:].set(False)   # some padded tail
  mask = mask_bool.astype(jnp.float32)
  params = init_params(k_params)
  wpack = pack_params(params)            # host-side, once (hoisted out of the forward)

  n_out, e_out = materialized_transformer_block(nodes, edges, mask, wpack)
  (n_out, e_out) = jax.block_until_ready((n_out, e_out))

  # correctness check against the PyTorch-layout reference
  n_ref, e_ref = reference_nchw(jnp.swapaxes(nodes, 1, 2),
                                jnp.transpose(edges, (0, 3, 1, 2)),
                                mask_bool, params)
  n_ref = jnp.swapaxes(n_ref, 1, 2)               # -> (B, S, CN)
  e_ref = jnp.transpose(e_ref, (0, 2, 3, 1))      # -> (B, S, S, CE)

  err_n = float(jnp.max(jnp.abs(n_out - n_ref)))
  err_e = float(jnp.max(jnp.abs(e_out - e_ref)))
  # tolerance covers default-precision MXU passes + approx reciprocal vs HIGHEST ref
  TOL = 1e-2
  assert err_n < TOL and err_e < TOL, (err_n, err_e)
  print("KERNEL_OK")
</pallas_src>

<mosaic_0001>
module attributes {stable_mosaic.version = 11 : i64} {
  func.func @mat_transformer_block_kernel(%arg0: memref<32x8xf32, #tpu.memory_space<vmem>>, %arg1: memref<32x64xf32, #tpu.memory_space<vmem>>, %arg2: memref<2x16xf32, #tpu.memory_space<vmem>>, %arg3: memref<688x128xf32, #tpu.memory_space<vmem>>, %arg4: memref<2x128xf32, #tpu.memory_space<vmem>>, %arg5: memref<32x64xf32, #tpu.memory_space<vmem>>) attributes {dimension_semantics = [], scalar_prefetch = 0 : i64, scratch_operands = 0 : i64, tpu.core_type = #tpu.core_type<tc>} {
    %c0 = arith.constant 0 : index
    %c0_0 = arith.constant 0 : index
    %0 = vector.load %arg2[%c0, %c0_0] : memref<2x16xf32, #tpu.memory_space<vmem>>, vector<2x16xf32>
    %c616 = arith.constant 616 : index
    %c0_1 = arith.constant 0 : index
    %1 = vector.load %arg3[%c616, %c0_1] : memref<688x128xf32, #tpu.memory_space<vmem>>, vector<32x2xf32>
    %cst = arith.constant dense<0.000000e+00> : vector<32x16xf32>
    %2 = tpu.matmul %1, %0, %cst {dimension_numbers = #tpu.dot_dimension_numbers<[1], [0], [0], [1], [0, 0, 1, 1], [], []>} : vector<32x2xf32>, vector<2x16xf32>, vector<32x16xf32> -> vector<32x16xf32>
    %c648 = arith.constant 648 : index
    %c0_2 = arith.constant 0 : index
    %3 = vector.load %arg3[%c648, %c0_2] : memref<688x128xf32, #tpu.memory_space<vmem>>, vector<32x16xf32>
    %4 = arith.mulf %2, %3 : vector<32x16xf32>
    %cst_3 = arith.constant dense<0.000000e+00> : vector<32xf32>
    %5 = vector.multi_reduction <add>, %4, %cst_3 [1] : vector<32x16xf32> to vector<32xf32>
    %6 = vector.shape_cast %5 : vector<32xf32> to vector<32x1xf32>
    %7 = vector.broadcast %6 : vector<32x1xf32> to vector<32x16xf32>
    %8 = arith.mulf %2, %7 : vector<32x16xf32>
    %cst_4 = arith.constant 1.000000e+00 : f32
    %9 = vector.broadcast %cst_4 : f32 to vector<32x16xf32>
    %10 = arith.subf %2, %9 : vector<32x16xf32>
    %cst_5 = arith.constant 1.000000e+30 : f32
    %11 = vector.broadcast %cst_5 : f32 to vector<32x16xf32>
    %12 = arith.mulf %10, %11 : vector<32x16xf32>
    %c0_6 = arith.constant 0 : index
    %c0_7 = arith.constant 0 : index
    %13 = vector.load %arg0[%c0_6, %c0_7] : memref<32x8xf32, #tpu.memory_space<vmem>>, vector<32x8xf32>
    %c0_8 = arith.constant 0 : index
    %c0_9 = arith.constant 0 : index
    %14 = vector.load %arg3[%c0_8, %c0_9] : memref<688x128xf32, #tpu.memory_space<vmem>>, vector<8x8xf32>
    %cst_10 = arith.constant dense<0.000000e+00> : vector<32x8xf32>
    %15 = tpu.matmul %13, %14, %cst_10 {dimension_numbers = #tpu.dot_dimension_numbers<[1], [0], [0], [1], [0, 0, 1, 1], [], []>} : vector<32x8xf32>, vector<8x8xf32>, vector<32x8xf32> -> vector<32x8xf32>
    %c680 = arith.constant 680 : index
    %c0_11 = arith.constant 0 : index
    %16 = vector.load %arg3[%c680, %c0_11] : memref<688x128xf32, #tpu.memory_space<vmem>>, vector<1x8xf32>
    %17 = vector.broadcast %16 : vector<1x8xf32> to vector<32x8xf32>
    %18 = arith.addf %15, %17 : vector<32x8xf32>
    %cst_12 = arith.constant 0.000000e+00 : f32
    %19 = vector.broadcast %cst_12 : f32 to vector<32x8xf32>
    %20 = arith.maximumf %18, %19 : vector<32x8xf32>
    %c8 = arith.constant 8 : index
    %c0_13 = arith.constant 0 : index
    %21 = vector.load %arg3[%c8, %c0_13] : memref<688x128xf32, #tpu.memory_space<vmem>>, vector<8x8xf32>
    %cst_14 = arith.constant dense<0.000000e+00> : vector<32x8xf32>
    %22 = tpu.matmul %20, %21, %cst_14 {dimension_numbers = #tpu.dot_dimension_numbers<[1], [0], [0], [1], [0, 0, 1, 1], [], []>} : vector<32x8xf32>, vector<8x8xf32>, vector<32x8xf32> -> vector<32x8xf32>
    %c681 = arith.constant 681 : index
    %c0_15 = arith.constant 0 : index
    %23 = vector.load %arg3[%c681, %c0_15] : memref<688x128xf32, #tpu.memory_space<vmem>>, vector<1x8xf32>
    %24 = vector.broadcast %23 : vector<1x8xf32> to vector<32x8xf32>
    %25 = arith.addf %22, %24 : vector<32x8xf32>
    %cst_16 = arith.constant 0.000000e+00 : f32
    %26 = vector.broadcast %cst_16 : f32 to vector<32x8xf32>
    %27 = arith.maximumf %25, %26 : vector<32x8xf32>
    %c682 = arith.constant 682 : index
    %c0_17 = arith.constant 0 : index
    %28 = vector.load %arg3[%c682, %c0_17] : memref<688x128xf32, #tpu.memory_space<vmem>>, vector<1x8xf32>
    %29 = vector.broadcast %28 : vector<1x8xf32> to vector<32x8xf32>
    %30 = arith.mulf %29, %27 : vector<32x8xf32>
    %31 = arith.addf %13, %30 : vector<32x8xf32>
    %c0_18 = arith.constant 0 : index
    %c0_19 = arith.constant 0 : index
    %32 = vector.load %arg1[%c0_18, %c0_19] : memref<32x64xf32, #tpu.memory_space<vmem>>, vector<32x64xf32>
    %c32 = arith.constant 32 : index
    %c0_20 = arith.constant 0 : index
    %33 = vector.load %arg3[%c32, %c0_20] : memref<688x128xf32, #tpu.memory_space<vmem>>, vector<64x64xf32>
    %cst_21 = arith.constant dense<0.000000e+00> : vector<32x64xf32>
    %34 = tpu.matmul %32, %33, %cst_21 {dimension_numbers = #tpu.dot_dimension_numbers<[1], [0], [0], [1], [0, 0, 1, 1], [], []>} : vector<32x64xf32>, vector<64x64xf32>, vector<32x64xf32> -> vector<32x64xf32>
    %c684 = arith.constant 684 : index
    %c0_22 = arith.constant 0 : index
    %35 = vector.load %arg3[%c684, %c0_22] : memref<688x128xf32, #tpu.memory_space<vmem>>, vector<1x64xf32>
    %36 = vector.broadcast %35 : vector<1x64xf32> to vector<32x64xf32>
    %37 = arith.addf %34, %36 : vector<32x64xf32>
    %cst_23 = arith.constant 0.000000e+00 : f32
    %38 = vector.broadcast %cst_23 : f32 to vector<32x64xf32>
    %39 = arith.maximumf %37, %38 : vector<32x64xf32>
    %c96 = arith.constant 96 : index
    %c0_24 = arith.constant 0 : index
    %40 = vector.load %arg3[%c96, %c0_24] : memref<688x128xf32, #tpu.memory_space<vmem>>, vector<64x64xf32>
    %cst_25 = arith.constant dense<0.000000e+00> : vector<32x64xf32>
    %41 = tpu.matmul %39, %40, %cst_25 {dimension_numbers = #tpu.dot_dimension_numbers<[1], [0], [0], [1], [0, 0, 1, 1], [], []>} : vector<32x64xf32>, vector<64x64xf32>, vector<32x64xf32> -> vector<32x64xf32>
    %c685 = arith.constant 685 : index
    %c0_26 = arith.constant 0 : index
    %42 = vector.load %arg3[%c685, %c0_26] : memref<688x128xf32, #tpu.memory_space<vmem>>, vector<1x64xf32>
    %43 = vector.broadcast %42 : vector<1x64xf32> to vector<32x64xf32>
    %44 = arith.addf %41, %43 : vector<32x64xf32>
    %cst_27 = arith.constant 0.000000e+00 : f32
    %45 = vector.broadcast %cst_27 : f32 to vector<32x64xf32>
    %46 = arith.maximumf %44, %45 : vector<32x64xf32>
    %c686 = arith.constant 686 : index
    %c0_28 = arith.constant 0 : index
    %47 = vector.load %arg3[%c686, %c0_28] : memref<688x128xf32, #tpu.memory_space<vmem>>, vector<1x64xf32>
    %48 = vector.broadcast %47 : vector<1x64xf32> to vector<32x64xf32>
    %49 = arith.mulf %48, %46 : vector<32x64xf32>
    %50 = arith.addf %32, %49 : vector<32x64xf32>
    %c16 = arith.constant 16 : index
    %c0_29 = arith.constant 0 : index
    %51 = vector.load %arg3[%c16, %c0_29] : memref<688x128xf32, #tpu.memory_space<vmem>>, vector<8x32xf32>
    %cst_30 = arith.constant dense<0.000000e+00> : vector<32x32xf32>
    %52 = tpu.matmul %31, %51, %cst_30 {dimension_numbers = #tpu.dot_dimension_numbers<[1], [0], [0], [1], [0, 0, 1, 1], [], []>} : vector<32x8xf32>, vector<8x32xf32>, vector<32x32xf32> -> vector<32x32xf32>
    %53 = vector.extract_strided_slice %52 {offsets = [0, 0], sizes = [32, 16], strides = [1, 1]} : vector<32x32xf32> to vector<32x16xf32>
    %54 = vector.extract_strided_slice %52 {offsets = [0, 16], sizes = [32, 16], strides = [1, 1]} : vector<32x32xf32> to vector<32x16xf32>
    %c24 = arith.constant 24 : index
    %c0_31 = arith.constant 0 : index
    %55 = vector.load %arg3[%c24, %c0_31] : memref<688x128xf32, #tpu.memory_space<vmem>>, vector<8x16xf32>
    %cst_32 = arith.constant dense<0.000000e+00> : vector<32x16xf32>
    %56 = tpu.matmul %31, %55, %cst_32 {dimension_numbers = #tpu.dot_dimension_numbers<[1], [0], [0], [1], [0, 0, 1, 1], [], []>} : vector<32x8xf32>, vector<8x16xf32>, vector<32x16xf32> -> vector<32x16xf32>
    %57 = arith.mulf %53, %54 : vector<32x16xf32>
    %c224 = arith.constant 224 : index
    %c0_33 = arith.constant 0 : index
    %58 = vector.load %arg3[%c224, %c0_33] : memref<688x128xf32, #tpu.memory_space<vmem>>, vector<16x2xf32>
    %cst_34 = arith.constant dense<0.000000e+00> : vector<32x2xf32>
    %59 = tpu.matmul %57, %58, %cst_34 {dimension_numbers = #tpu.dot_dimension_numbers<[1], [0], [0], [1], [0, 0, 1, 1], [], []>} : vector<32x16xf32>, vector<16x2xf32>, vector<32x2xf32> -> vector<32x2xf32>
    %cst_35 = arith.constant 0.000000e+00 : f32
    %60 = vector.broadcast %cst_35 : f32 to vector<32x12xf32>
    %c240 = arith.constant 240 : index
    %c0_36 = arith.constant 0 : index
    %61 = vector.load %arg3[%c240, %c0_36] : memref<688x128xf32, #tpu.memory_space<vmem>>, vector<16x64xf32>
    %cst_37 = arith.constant dense<0.000000e+00> : vector<32x64xf32>
    %62 = tpu.matmul %53, %61, %cst_37 {dimension_numbers = #tpu.dot_dimension_numbers<[1], [0], [0], [1], [0, 0, 1, 1], [], []>} : vector<32x16xf32>, vector<16x64xf32>, vector<32x64xf32> -> vector<32x64xf32>
    %63 = arith.mulf %50, %62 : vector<32x64xf32>
    %c272 = arith.constant 272 : index
    %c0_38 = arith.constant 0 : index
    %64 = vector.load %arg3[%c272, %c0_38] : memref<688x128xf32, #tpu.memory_space<vmem>>, vector<64x16xf32>
    %cst_39 = arith.constant dense<0.000000e+00> : vector<32x16xf32>
    %65 = tpu.matmul %63, %64, %cst_39 {dimension_numbers = #tpu.dot_dimension_numbers<[1], [0], [0], [1], [0, 0, 1, 1], [], []>} : vector<32x64xf32>, vector<64x16xf32>, vector<32x16xf32> -> vector<32x16xf32>
    %66 = vector.extract_strided_slice %59 {offsets = [0, 0], sizes = [32, 1], strides = [1, 1]} : vector<32x2xf32> to vector<32x1xf32>
    %67 = vector.broadcast %66 : vector<32x1xf32> to vector<32x16xf32>
    %68 = arith.addf %65, %67 : vector<32x16xf32>
    %cst_40 = arith.constant 0.353553385 : f32
    %69 = vector.broadcast %cst_40 : f32 to vector<32x16xf32>
    %70 = arith.mulf %68, %69 : vector<32x16xf32>
    %71 = arith.addf %70, %12 : vector<32x16xf32>
    %cst_41 = arith.constant dense<0xFF800000> : vector<32xf32>
    %72 = vector.multi_reduction <maximumf>, %71, %cst_41 [1] : vector<32x16xf32> to vector<32xf32>
    %73 = vector.shape_cast %72 : vector<32xf32> to vector<32x1xf32>
    %74 = vector.broadcast %73 : vector<32x1xf32> to vector<32x16xf32>
    %75 = arith.subf %71, %74 : vector<32x16xf32>
    %76 = math.exp %75 : vector<32x16xf32>
    %cst_42 = arith.constant dense<0.000000e+00> : vector<32xf32>
    %77 = vector.multi_reduction <add>, %76, %cst_42 [1] : vector<32x16xf32> to vector<32xf32>
    %78 = vector.shape_cast %77 : vector<32xf32> to vector<32x1xf32>
    %79 = tpu.reciprocal %78 {approx = true} : vector<32x1xf32> -> vector<32x1xf32>
    %80 = vector.broadcast %79 : vector<32x1xf32> to vector<32x16xf32>
    %81 = arith.mulf %76, %80 : vector<32x16xf32>
    %82 = arith.mulf %81, %8 : vector<32x16xf32>
    %cst_43 = arith.constant dense<0.000000e+00> : vector<32xf32>
    %83 = vector.multi_reduction <add>, %82, %cst_43 [1] : vector<32x16xf32> to vector<32xf32>
    %84 = vector.shape_cast %83 : vector<32xf32> to vector<32x1xf32>
    %85 = vector.extract_strided_slice %56 {offsets = [0, 0], sizes = [32, 8], strides = [1, 1]} : vector<32x16xf32> to vector<32x8xf32>
    %86 = vector.broadcast %84 : vector<32x1xf32> to vector<32x8xf32>
    %87 = arith.mulf %86, %85 : vector<32x8xf32>
    %c336 = arith.constant 336 : index
    %c0_44 = arith.constant 0 : index
    %88 = vector.load %arg3[%c336, %c0_44] : memref<688x128xf32, #tpu.memory_space<vmem>>, vector<16x64xf32>
    %cst_45 = arith.constant dense<0.000000e+00> : vector<32x64xf32>
    %89 = tpu.matmul %82, %88, %cst_45 {dimension_numbers = #tpu.dot_dimension_numbers<[1], [0], [0], [1], [0, 0, 1, 1], [], []>} : vector<32x16xf32>, vector<16x64xf32>, vector<32x64xf32> -> vector<32x64xf32>
    %90 = arith.mulf %89, %50 : vector<32x64xf32>
    %c352 = arith.constant 352 : index
    %c0_46 = arith.constant 0 : index
    %91 = vector.load %arg3[%c352, %c0_46] : memref<688x128xf32, #tpu.memory_space<vmem>>, vector<64x8xf32>
    %cst_47 = arith.constant dense<0.000000e+00> : vector<32x8xf32>
    %92 = tpu.matmul %90, %91, %cst_47 {dimension_numbers = #tpu.dot_dimension_numbers<[1], [0], [0], [1], [0, 0, 1, 1], [], []>} : vector<32x64xf32>, vector<64x8xf32>, vector<32x8xf32> -> vector<32x8xf32>
    %93 = arith.addf %87, %92 : vector<32x8xf32>
    %c480 = arith.constant 480 : index
    %c0_48 = arith.constant 0 : index
    %94 = vector.load %arg3[%c480, %c0_48] : memref<688x128xf32, #tpu.memory_space<vmem>>, vector<8x12xf32>
    %cst_49 = arith.constant dense<0.000000e+00> : vector<32x12xf32>
    %95 = tpu.matmul %93, %94, %cst_49 {dimension_numbers = #tpu.dot_dimension_numbers<[1], [0], [0], [1], [0, 0, 1, 1], [], []>} : vector<32x8xf32>, vector<8x12xf32>, vector<32x12xf32> -> vector<32x12xf32>
    %96 = arith.addf %60, %95 : vector<32x12xf32>
    %c256 = arith.constant 256 : index
    %c0_50 = arith.constant 0 : index
    %97 = vector.load %arg3[%c256, %c0_50] : memref<688x128xf32, #tpu.memory_space<vmem>>, vector<16x64xf32>
    %cst_51 = arith.constant dense<0.000000e+00> : vector<32x64xf32>
    %98 = tpu.matmul %53, %97, %cst_51 {dimension_numbers = #tpu.dot_dimension_numbers<[1], [0], [0], [1], [0, 0, 1, 1], [], []>} : vector<32x16xf32>, vector<16x64xf32>, vector<32x64xf32> -> vector<32x64xf32>
    %99 = arith.mulf %50, %98 : vector<32x64xf32>
    %c272_52 = arith.constant 272 : index
    %c0_53 = arith.constant 0 : index
    %100 = vector.load %arg3[%c272_52, %c0_53] : memref<688x128xf32, #tpu.memory_space<vmem>>, vector<64x16xf32>
    %cst_54 = arith.constant dense<0.000000e+00> : vector<32x16xf32>
    %101 = tpu.matmul %99, %100, %cst_54 {dimension_numbers = #tpu.dot_dimension_numbers<[1], [0], [0], [1], [0, 0, 1, 1], [], []>} : vector<32x64xf32>, vector<64x16xf32>, vector<32x16xf32> -> vector<32x16xf32>
    %102 = vector.extract_strided_slice %59 {offsets = [0, 1], sizes = [32, 1], strides = [1, 1]} : vector<32x2xf32> to vector<32x1xf32>
    %103 = vector.broadcast %102 : vector<32x1xf32> to vector<32x16xf32>
    %104 = arith.addf %101, %103 : vector<32x16xf32>
    %cst_55 = arith.constant 0.353553385 : f32
    %105 = vector.broadcast %cst_55 : f32 to vector<32x16xf32>
    %106 = arith.mulf %104, %105 : vector<32x16xf32>
    %107 = arith.addf %106, %12 : vector<32x16xf32>
    %cst_56 = arith.constant dense<0xFF800000> : vector<32xf32>
    %108 = vector.multi_reduction <maximumf>, %107, %cst_56 [1] : vector<32x16xf32> to vector<32xf32>
    %109 = vector.shape_cast %108 : vector<32xf32> to vector<32x1xf32>
    %110 = vector.broadcast %109 : vector<32x1xf32> to vector<32x16xf32>
    %111 = arith.subf %107, %110 : vector<32x16xf32>
    %112 = math.exp %111 : vector<32x16xf32>
    %cst_57 = arith.constant dense<0.000000e+00> : vector<32xf32>
    %113 = vector.multi_reduction <add>, %112, %cst_57 [1] : vector<32x16xf32> to vector<32xf32>
    %114 = vector.shape_cast %113 : vector<32xf32> to vector<32x1xf32>
    %115 = tpu.reciprocal %114 {approx = true} : vector<32x1xf32> -> vector<32x1xf32>
    %116 = vector.broadcast %115 : vector<32x1xf32> to vector<32x16xf32>
    %117 = arith.mulf %112, %116 : vector<32x16xf32>
    %118 = arith.mulf %117, %8 : vector<32x16xf32>
    %cst_58 = arith.constant dense<0.000000e+00> : vector<32xf32>
    %119 = vector.multi_reduction <add>, %118, %cst_58 [1] : vector<32x16xf32> to vector<32xf32>
    %120 = vector.shape_cast %119 : vector<32xf32> to vector<32x1xf32>
    %121 = vector.extract_strided_slice %56 {offsets = [0, 8], sizes = [32, 8], strides = [1, 1]} : vector<32x16xf32> to vector<32x8xf32>
    %122 = vector.broadcast %120 : vector<32x1xf32> to vector<32x8xf32>
    %123 = arith.mulf %122, %121 : vector<32x8xf32>
    %c336_59 = arith.constant 336 : index
    %c0_60 = arith.constant 0 : index
    %124 = vector.load %arg3[%c336_59, %c0_60] : memref<688x128xf32, #tpu.memory_space<vmem>>, vector<16x64xf32>
    %cst_61 = arith.constant dense<0.000000e+00> : vector<32x64xf32>
    %125 = tpu.matmul %118, %124, %cst_61 {dimension_numbers = #tpu.dot_dimension_numbers<[1], [0], [0], [1], [0, 0, 1, 1], [], []>} : vector<32x16xf32>, vector<16x64xf32>, vector<32x64xf32> -> vector<32x64xf32>
    %126 = arith.mulf %125, %50 : vector<32x64xf32>
    %c416 = arith.constant 416 : index
    %c0_62 = arith.constant 0 : index
    %127 = vector.load %arg3[%c416, %c0_62] : memref<688x128xf32, #tpu.memory_space<vmem>>, vector<64x8xf32>
    %cst_63 = arith.constant dense<0.000000e+00> : vector<32x8xf32>
    %128 = tpu.matmul %126, %127, %cst_63 {dimension_numbers = #tpu.dot_dimension_numbers<[1], [0], [0], [1], [0, 0, 1, 1], [], []>} : vector<32x64xf32>, vector<64x8xf32>, vector<32x8xf32> -> vector<32x8xf32>
    %129 = arith.addf %123, %128 : vector<32x8xf32>
    %c488 = arith.constant 488 : index
    %c0_64 = arith.constant 0 : index
    %130 = vector.load %arg3[%c488, %c0_64] : memref<688x128xf32, #tpu.memory_space<vmem>>, vector<8x12xf32>
    %cst_65 = arith.constant dense<0.000000e+00> : vector<32x12xf32>
    %131 = tpu.matmul %129, %130, %cst_65 {dimension_numbers = #tpu.dot_dimension_numbers<[1], [0], [0], [1], [0, 0, 1, 1], [], []>} : vector<32x8xf32>, vector<8x12xf32>, vector<32x12xf32> -> vector<32x12xf32>
    %132 = arith.addf %96, %131 : vector<32x12xf32>
    %133 = vector.extract_strided_slice %132 {offsets = [0, 0], sizes = [32, 8], strides = [1, 1]} : vector<32x12xf32> to vector<32x8xf32>
    %134 = vector.extract_strided_slice %132 {offsets = [0, 8], sizes = [32, 4], strides = [1, 1]} : vector<32x12xf32> to vector<32x4xf32>
    %c683 = arith.constant 683 : index
    %c0_66 = arith.constant 0 : index
    %135 = vector.load %arg3[%c683, %c0_66] : memref<688x128xf32, #tpu.memory_space<vmem>>, vector<1x8xf32>
    %136 = vector.broadcast %135 : vector<1x8xf32> to vector<32x8xf32>
    %137 = arith.mulf %136, %133 : vector<32x8xf32>
    %138 = arith.addf %31, %137 : vector<32x8xf32>
    %139 = vector.broadcast %6 : vector<32x1xf32> to vector<32x8xf32>
    %140 = arith.mulf %138, %139 : vector<32x8xf32>
    %c504 = arith.constant 504 : index
    %c0_67 = arith.constant 0 : index
    %141 = vector.load %arg3[%c504, %c0_67] : memref<688x128xf32, #tpu.memory_space<vmem>>, vector<8x128xf32>
    %cst_68 = arith.constant dense<0.000000e+00> : vector<32x128xf32>
    %142 = tpu.matmul %140, %141, %cst_68 {dimension_numbers = #tpu.dot_dimension_numbers<[1], [0], [0], [1], [0, 0, 1, 1], [], []>} : vector<32x8xf32>, vector<8x128xf32>, vector<32x128xf32> -> vector<32x128xf32>
    %c544 = arith.constant 544 : index
    %c0_69 = arith.constant 0 : index
    %143 = vector.load %arg3[%c544, %c0_69] : memref<688x128xf32, #tpu.memory_space<vmem>>, vector<32x128xf32>
    %144 = arith.mulf %142, %143 : vector<32x128xf32>
    %c576 = arith.constant 576 : index
    %c0_70 = arith.constant 0 : index
    %145 = vector.load %arg3[%c576, %c0_70] : memref<688x128xf32, #tpu.memory_space<vmem>>, vector<2x32xf32>
    %cst_71 = arith.constant dense<0.000000e+00> : vector<2x128xf32>
    %146 = tpu.matmul %145, %144, %cst_71 {dimension_numbers = #tpu.dot_dimension_numbers<[1], [0], [0], [1], [0, 0, 1, 1], [], []>} : vector<2x32xf32>, vector<32x128xf32>, vector<2x128xf32> -> vector<2x128xf32>
    %c0_72 = arith.constant 0 : index
    %c0_73 = arith.constant 0 : index
    %147 = vector.load %arg4[%c0_72, %c0_73] : memref<2x128xf32, #tpu.memory_space<vmem>>, vector<2x128xf32>
    tpu.vector_store %arg4[%c0_72, %c0_73], %146 {strides = array<i32>} : memref<2x128xf32, #tpu.memory_space<vmem>>, vector<2x128xf32>,
    %c160 = arith.constant 160 : index
    %c0_74 = arith.constant 0 : index
    %148 = vector.load %arg3[%c160, %c0_74] : memref<688x128xf32, #tpu.memory_space<vmem>>, vector<64x64xf32>
    %cst_75 = arith.constant dense<0.000000e+00> : vector<32x64xf32>
    %149 = tpu.matmul %50, %148, %cst_75 {dimension_numbers = #tpu.dot_dimension_numbers<[1], [0], [0], [1], [0, 0, 1, 1], [], []>} : vector<32x64xf32>, vector<64x64xf32>, vector<32x64xf32> -> vector<32x64xf32>
    %c496 = arith.constant 496 : index
    %c0_76 = arith.constant 0 : index
    %150 = vector.load %arg3[%c496, %c0_76] : memref<688x128xf32, #tpu.memory_space<vmem>>, vector<4x64xf32>
    %cst_77 = arith.constant dense<0.000000e+00> : vector<32x64xf32>
    %151 = tpu.matmul %134, %150, %cst_77 {dimension_numbers = #tpu.dot_dimension_numbers<[1], [0], [0], [1], [0, 0, 1, 1], [], []>} : vector<32x4xf32>, vector<4x64xf32>, vector<32x64xf32> -> vector<32x64xf32>
    %c584 = arith.constant 584 : index
    %c0_78 = arith.constant 0 : index
    %152 = vector.load %arg3[%c584, %c0_78] : memref<688x128xf32, #tpu.memory_space<vmem>>, vector<32x32xf32>
    %c512 = arith.constant 512 : index
    %c0_79 = arith.constant 0 : index
    %153 = vector.load %arg3[%c512, %c0_79] : memref<688x128xf32, #tpu.memory_space<vmem>>, vector<32x64xf32>
    %154 = arith.mulf %151, %153 : vector<32x64xf32>
    %cst_80 = arith.constant dense<0.000000e+00> : vector<32x64xf32>
    %155 = tpu.matmul %152, %154, %cst_80 {dimension_numbers = #tpu.dot_dimension_numbers<[1], [0], [0], [1], [0, 0, 1, 1], [], []>} : vector<32x32xf32>, vector<32x64xf32>, vector<32x64xf32> -> vector<32x64xf32>
    %156 = arith.addf %151, %155 : vector<32x64xf32>
    %cst_81 = arith.constant 5.000000e-01 : f32
    %157 = vector.broadcast %cst_81 : f32 to vector<32x64xf32>
    %158 = arith.mulf %157, %156 : vector<32x64xf32>
    %159 = arith.addf %158, %149 : vector<32x64xf32>
    %c336_82 = arith.constant 336 : index
    %c0_83 = arith.constant 0 : index
    %160 = vector.load %arg3[%c336_82, %c0_83] : memref<688x128xf32, #tpu.memory_space<vmem>>, vector<16x64xf32>
    %cst_84 = arith.constant dense<0.000000e+00> : vector<32x64xf32>
    %161 = tpu.matmul %8, %160, %cst_84 {dimension_numbers = #tpu.dot_dimension_numbers<[1], [0], [0], [1], [0, 0, 1, 1], [], []>} : vector<32x16xf32>, vector<16x64xf32>, vector<32x64xf32> -> vector<32x64xf32>
    %c687 = arith.constant 687 : index
    %c0_85 = arith.constant 0 : index
    %162 = vector.load %arg3[%c687, %c0_85] : memref<688x128xf32, #tpu.memory_space<vmem>>, vector<1x64xf32>
    %163 = vector.broadcast %162 : vector<1x64xf32> to vector<32x64xf32>
    %164 = arith.mulf %163, %159 : vector<32x64xf32>
    %165 = arith.addf %50, %164 : vector<32x64xf32>
    %166 = arith.mulf %165, %161 : vector<32x64xf32>
    %c0_86 = arith.constant 0 : index
    %c0_87 = arith.constant 0 : index
    %167 = vector.load %arg5[%c0_86, %c0_87] : memref<32x64xf32, #tpu.memory_space<vmem>>, vector<32x64xf32>
    tpu.vector_store %arg5[%c0_86, %c0_87], %166 {strides = array<i32>} : memref<32x64xf32, #tpu.memory_space<vmem>>, vector<32x64xf32>,
    return
  }
}

</mosaic_0001>

<bundles_post_ra>
// kernel: materialized_transformer_block.1
= control target key start
LH: loop header
LB: loop body
LE: loop exit
PB: predicated region body
PF: predicated region fallthrough
CT: control target
= control target key end

     0   :  { %11 = vsyncpa [#allocation3], 0  ;;  %s1651_s21 = smov [#allocation2]   ;;  %s1652_s23 = smov 128   ;;  %s2105_s0 = inlined_call_operand.vmem [shape: f32[32,8], index: 0, kind: input, shape index: {}]   ;;  %s2106_s1 = inlined_call_operand.vmem [shape: f32[32,64], index: 1, kind: input, shape index: {}]   ;;  %s2107_s2 = inlined_call_operand.vmem [shape: f32[2,16], index: 2, kind: input, shape index: {}]   ;;  %s2108_s3 = inlined_call_operand.hbm [shape: f32[688,128], index: 3, kind: input, shape index: {}]   ;;  %s2109_s4 = inlined_call_operand.vmem [shape: f32[2,128], index: 4, kind: output, shape index: {0}]   ;;  %s2110_s5 = inlined_call_operand.vmem [shape: f32[32,64], index: 5, kind: output, shape index: {1}]  }
   0x1   :  { %s22_s20 = sshll.u32 %s2108_s3, 4  ;;  %s24_s22 = sshll.u32 %s1651_s21, 4  ;;  %s23_s20 = int_to_ptr.hbm [resolvable:$true] %s22_s20  ;;  %s25_s22 = int_to_ptr.vmem [resolvable:$true] %s24_s22 }
   0x2   :  { %s1653_s24 = smov 8  }
   0x3   :  { %30 = dma.hbm_to_vmem [thread:$0]  %s23_s20, 11008, %s25_s22, [#allocation3], %s1652_s23, %s1652_s23, %s1653_s24  }
   0x4   :  { %1649 = dma.done.wait [#allocation3], 11008  }
   0x5   :  { %1650 = vsyncadd [#allocation3], 4294956288  ;;  %vm126_vm0 = vcmask 64512   ;;  %v123_v0 = vld [vmem:[#allocation2] sm:$0xff]  ;;  %v1702_v2 = vld [vmem:[%s2105_s0 + $0x8] sm:$0xff]  ;;  %vm244_vm1 = vcmask 523264  }
   0x6   :  { %v1695_v1 = vld [vmem:[%s2105_s0] sm:$0xff]  ;;  %154 = vmatpush.msra.mxu1 %v123_v0  ;;  %v1709_v3 = vld [vmem:[%s2105_s0 + $0x10] sm:$0xff]  ;;  %v1716_v4 = vld [vmem:[%s2105_s0 + $0x18] sm:$0xff]  ;;  %vm53_vm2 = vcmask 1041408   ;;  %vm40_vm3 = vcmask 15360   ;;  %vm94_vm4 = vcmask 130048  }
   0x7   :  { %1482 = vmatmul.msk.f32.vlgmr.msra.gmra.mxu1 %vm126_vm0, %v1695_v1  ;;  %v172_v5 = vld [vmem:[#allocation2 + $0x8] sm:$0xff]  ;;  %v241_v7 = vld [vmem:[#allocation2 + $0x58] sm:$0xff]  ;;  %v240_v8 = vld [vmem:[#allocation2 + $0x50] sm:$0xff]  ;;  %vm1305_vm5 = vcmask 1043456   ;;  %vm1296_vm6 = vcmask 31744   ;;  %vm1209_vm7 = vcmask 261120  }
   0x8   :  { %202 = vmatpush.msra.mxu2 %v172_v5  ;;  %v1585_v6 = vld [vmem:[#allocation2 + $0x2a8] ss:$0 sm:$0xff]  ;;  %265 = vmatpush.msra.mxu3 %v241_v7  ;;  %v238_v12 = vld [vmem:[#allocation2 + $0x40] sm:$0xff]  ;;  %v237_v14 = vld [vmem:[#allocation2 + $0x38] sm:$0xff] }
   0x9   :  { %v239_v9 = vld [vmem:[#allocation2 + $0x48] sm:$0xff]  ;;  %v236_v15 = vld [vmem:[#allocation2 + $0x30] sm:$0xff]  ;;  %v234_v19 = vld [vmem:[#allocation2 + $0x20] sm:$0xff] }
   0xa   :  { %266 = vmatpush.msra.mxu3 %v240_v8  ;;  %v235_v16 = vld [vmem:[#allocation2 + $0x28] sm:$0xff]  ;;  %v1724_v20 = vld [vmem:[%s2106_s1] sm:$0xff]  ;;  %v1740_v28 = vld [vmem:[%s2106_s1 + $0x10] sm:$0xff] }
   0xb   :  { %v1732_v24 = vld [vmem:[%s2106_s1 + $0x8] sm:$0xff]  ;;  %v1748_v30 = vld [vmem:[%s2106_s1 + $0x18] sm:$0xff]  ;;  %v355_v31 = vld [vmem:[#allocation2 + $0x10] sm:$0xff]  ;;  %s1654_s1 = smov 112  }
   0xc   :  { %267 = vmatpush.msra.mxu3 %v239_v9  ;;  %v397_v32 = vld [vmem:[#allocation2 + $0x18] sm:$0xff]  ;;  %383 = vmatpush.msrb.mxu1 %v355_v31  ;;  %v1586_v33 = vld [vmem:[#allocation2 + $0x2a9] ss:$0 sm:$0xff]  ;;  %v1587_v35 = vld [vmem:[#allocation2 + $0x2aa] ss:$0 sm:$0xff] }
   0xd   :  { %413 = vmatpush.msrb.mxu2 %v397_v32  ;;  %v35_v37 = vld [vmem:[%s2107_s2] sm:$0x3]  ;;  %v36_v38 = vld [vmem:[#allocation2 + $0x268] sm:$0xff]  ;;  %v297_v39 = vld [vmem:[#allocation2 + $0x98] sm:$0xff]  ;;  %s1657_s2 = smov 120  }
   0xe   :  { %268 = vmatpush.msra.mxu3 %v238_v12  ;;  %1473 = vmatpush.msk.msra.mxu0 %vm53_vm2, %v35_v37  ;;  %v296_v41 = vld [vmem:[#allocation2 + $0x90] sm:$0xff]  ;;  %v295_v43 = vld [vmem:[#allocation2 + $0x88] sm:$0xff]  ;;  %v294_v45 = vld [vmem:[#allocation2 + $0x80] sm:$0xff] }
   0xf   :  { %1483 = vmatmul.msk.f32.gmra.mxu1 %vm126_vm0, %v1702_v2  ;;  %1474 = vmatmul.msk.f32.vlgmr.msra.gmra.mxu0 %vm40_vm3, %v36_v38  ;;  %v37_v47 = vld [vmem:[#allocation2 + $0x270] sm:$0xff]  ;;  %v293_v49 = vld [vmem:[#allocation2 + $0x78] sm:$0xff]  ;;  %v291_v53 = vld [vmem:[#allocation2 + $0x68] sm:$0xff] }
  0x10   :  { %269 = vmatpush.msra.mxu3 %v237_v14  ;;  %320 = vmatpush.msrb.mxu0 %v297_v39  ;;  %v292_v51 = vld [vmem:[#allocation2 + $0x70] sm:$0xff]  ;;  %v290_v55 = vld [vmem:[#allocation2 + $0x60] sm:$0xff]  ;;  %v38_v57 = vld [vmem:[#allocation2 + $0x278] sm:$0xff] }
  0x11   :  { %v1588_v63 = vld [vmem:[#allocation2 + $0x2ac] ss:$0 sm:$0xff]  ;;  %v491_v7 = vld [vmem:[#allocation2 + $0xf8] sm:$0xff]  ;;  %v537_v39 = vld [vmem:[#allocation2 + $0x130] sm:$0xff] }
  0x12   :  { %270 = vmatpush.msra.mxu3 %v236_v15  ;;  %321 = vmatpush.msrb.mxu0 %v296_v41  ;;  %v540_v31 = vld [vmem:[#allocation2 + $0x148] sm:$0xff]  ;;  %v538_v37 = vld [vmem:[#allocation2 + $0x138] sm:$0xff]  ;;  %v535_v41 = vld [vmem:[#allocation2 + $0x120] sm:$0xff] }
  0x13   :  { %581 = vmatpush.msra.mxu1 %v540_v31 }
  0x14   :  { %271 = vmatpush.msra.mxu3 %v235_v16  ;;  %322 = vmatpush.msrb.mxu0 %v295_v43  ;;  %v533_v43 = vld [vmem:[#allocation2 + $0x110] sm:$0xff] }
  0x16   :  { %272 = vmatpush.msra.mxu3 %v234_v19  ;;  %323 = vmatpush.msrb.mxu0 %v294_v45  ;;  %v776_v19 = vld [vmem:[#allocation2 + $0x108] sm:$0xff] }
  0x17   :  { %1484 = vmatmul.msk.f32.gmra.mxu1 %vm126_vm0, %v1709_v3  ;;  %1490 = vmatmul.msk.f32.vlgmr.msra.gmra.mxu3 %vm244_vm1, %v1724_v20 }
  0x18   :  { %1475 = vmatmul.msk.f32.gmra.mxu0 %vm40_vm3, %v37_v47  ;;  %v1589_v47 = vld [vmem:[#allocation2 + $0x2ad] ss:$0 sm:$0xff] }
  0x19   :  { %324 = vmatpush.msrb.mxu0 %v293_v49 }
  0x1b   :  { %325 = vmatpush.msrb.mxu0 %v292_v51 }
  0x1d   :  { %326 = vmatpush.msrb.mxu0 %v291_v53 }
  0x1f   :  { %1485 = vmatmul.msk.f32.gmra.mxu1 %vm126_vm0, %v1716_v4  ;;  %1491 = vmatmul.msk.f32.gmra.mxu3 %vm244_vm1, %v1732_v24 }
  0x20   :  { %327 = vmatpush.msrb.mxu0 %v290_v55 }
  0x21   :  { %1476 = vmatmul.msk.f32.gmra.mxu0 %vm40_vm3, %v38_v57 }
  0x22   :  { %514 = vmatpush.msra.mxu0 %v491_v7 }
  0x27   :  { %1492 = vmatmul.msk.f32.gmra.mxu3 %vm244_vm1, %v1740_v28 }
  0x2f   :  { %1493 = vmatmul.msk.f32.gmra.mxu3 %vm244_vm1, %v1748_v30 }
  0x84   :  { %v156_v10 = vpop.f32.mrf.mxu1 }
  0x85   :  { %v157_v11 = vadd.f32 %v1585_v6, %v156_v10 }
  0x87   :  { %v168_v13 = vmax.f32 %v157_v11, 0.0 }
  0x89   :  { %1486 = vmatmul.msk.f32.vlgmr.msra.gmra.mxu2 %vm126_vm0, %v168_v13 }
  0x8c   :  { %v159_v17 = vpop.f32.mrf.mxu1 }
  0x8d   :  { %v160_v18 = vadd.f32 %v1585_v6, %v159_v17 }
  0x8f   :  { %v169_v21 = vmax.f32 %v160_v18, 0.0  ;;  %v490_v18 = vld [vmem:[#allocation2 + $0xf0] sm:$0xff] }
  0x90   :  { %515 = vmatpush.msra.mxu0 %v490_v18 }
  0x91   :  { %1487 = vmatmul.msk.f32.gmra.mxu2 %vm126_vm0, %v169_v21  ;;  %v775_v21 = vld [vmem:[#allocation2 + $0x100] sm:$0xff] }
  0x94   :  { %v162_v22 = vpop.f32.mrf.mxu1 }
  0x95   :  { %v163_v23 = vadd.f32 %v1585_v6, %v162_v22 }
  0x97   :  { %v170_v25 = vmax.f32 %v163_v23, 0.0 }
  0x99   :  { %1488 = vmatmul.msk.f32.gmra.mxu2 %vm126_vm0, %v170_v25 }
  0x9a   :  { %v274_v59 = vpop.f32.mrf.mxu3 }
  0x9c   :  { %v165_v26 = vpop.f32.mrf.mxu1 }
  0x9d   :  { %v166_v27 = vadd.f32 %v1585_v6, %v165_v26  ;;  %v275_v6 = vadd.f32 %v1588_v63, %v274_v59 }
  0x9f   :  { %v171_v29 = vmax.f32 %v166_v27, 0.0  ;;  %v286_v10 = vmax.f32 %v275_v6, 0.0  ;;  %v1805_v27 = vpop.f32.mrf.mxu0 }
  0xa1   :  { %1489 = vmatmul.msk.f32.gmra.mxu2 %vm126_vm0, %v171_v29  ;;  %v448_v29 = vld [vmem:[#allocation2 + $0xe8] sm:$0xff] }
  0xa2   :  { %v277_v8 = vpop.f32.mrf.mxu3  ;;  %475 = vmatpush.msrb.mxu3 %v448_v29 }
  0xa3   :  { %v278_v11 = vadd.f32 %v1588_v63, %v277_v8 }
  0xa5   :  { %v287_v13 = vmax.f32 %v278_v11, 0.0 }
  0xa7   :  { %v1809_v32 = vpop.f32.mrf.mxu0 }
  0xaa   :  { %v280_v12 = vpop.f32.mrf.mxu3 }
  0xab   :  { %v281_v14 = vadd.f32 %v1588_v63, %v280_v12 }
  0xad   :  { %v288_v15 = vmax.f32 %v281_v14, 0.0 }
  0xb2   :  { %v283_v16 = vpop.f32.mrf.mxu3 }
 0x10c   :  { %v204_v34 = vpop.f32.mrf.mxu2 }
 0x10d   :  { %v205_v36 = vadd.f32 %v1586_v33, %v204_v34 }
 0x10f   :  { %v216_v40 = vmax.f32 %v205_v36, 0.0  ;;  %v447_v36 = vld [vmem:[#allocation2 + $0xe0] sm:$0xff] }
 0x110   :  { %476 = vmatpush.msrb.mxu3 %v447_v36 }
 0x111   :  { %v222_v42 = vmul.f32 %v1587_v35, %v216_v40  ;;  %v536_v40 = vld [vmem:[#allocation2 + $0x128] sm:$0xff] }
 0x113   :  { %v1757_v44 = vadd.f32 %v222_v42, %v1695_v1  ;;  %v39_v1 = vld [vmem:[#allocation2 + $0x280] sm:$0xff]  ;;  %v534_v42 = vld [vmem:[#allocation2 + $0x118] sm:$0xff] }
 0x114   :  { %v207_v46 = vpop.f32.mrf.mxu2  ;;  %1477 = vmatmul.msk.f32.gmra.mxu0 %vm40_vm3, %v39_v1 }
 0x115   :  { %v208_v48 = vadd.f32 %v1586_v33, %v207_v46  ;;  %1498 = vmatmul.msk.f32.vlgmr.msrb.gmra.mxu1 %vm126_vm0, %v1757_v44  ;;  %1502 = vmatmul.msk.f32.vlgmr.msrb.gmra.mxu2 %vm126_vm0, %v1757_v44 }
 0x117   :  { %v217_v50 = vmax.f32 %v208_v48, 0.0 }
 0x119   :  { %v223_v52 = vmul.f32 %v1587_v35, %v217_v50  ;;  %v1590_v50 = vld [vmem:[#allocation2 + $0x2ae] ss:$0 sm:$0xff] }
 0x11b   :  { %v1765_v54 = vadd.f32 %v223_v52, %v1702_v2 }
 0x11c   :  { %v210_v56 = vpop.f32.mrf.mxu2  ;;  %1494 = vmatmul.msk.f32.vlgmr.msrb.gmra.mxu0 %vm244_vm1, %v286_v10 }
 0x11d   :  { %v211_v58 = vadd.f32 %v1586_v33, %v210_v56  ;;  %1499 = vmatmul.msk.f32.gmra.mxu1 %vm126_vm0, %v1765_v54  ;;  %1503 = vmatmul.msk.f32.gmra.mxu2 %vm126_vm0, %v1765_v54 }
 0x11e   :  { %791 = vmatpush.msrb.mxu0 %v776_v19 }
 0x11f   :  { %v218_v60 = vmax.f32 %v211_v58, 0.0 }
 0x120   :  { %792 = vmatpush.msrb.mxu0 %v775_v21 }
 0x121   :  { %v224_v61 = vmul.f32 %v1587_v35, %v218_v60 }
 0x123   :  { %v1773_v62 = vadd.f32 %v224_v61, %v1709_v3 }
 0x124   :  { %v213_v0 = vpop.f32.mrf.mxu2  ;;  %1495 = vmatmul.msk.f32.gmra.mxu0 %vm244_vm1, %v287_v13 }
 0x125   :  { %v214_v2 = vadd.f32 %v1586_v33, %v213_v0  ;;  %1500 = vmatmul.msk.f32.gmra.mxu1 %vm126_vm0, %v1773_v62  ;;  %1504 = vmatmul.msk.f32.gmra.mxu2 %vm126_vm0, %v1773_v62  ;;  %v1813_v33 = vpop.f32.mrf.mxu0 }
 0x127   :  { %v219_v5 = vmax.f32 %v214_v2, 0.0 }
 0x129   :  { %v225_v9 = vmul.f32 %v1587_v35, %v219_v5  ;;  %v539_v35 = vld [vmem:[#allocation2 + $0x140] sm:$0xff] }
 0x12a   :  { %582 = vmatpush.msra.mxu1 %v539_v35 }
 0x12b   :  { %v1781_v3 = vadd.f32 %v225_v9, %v1716_v4  ;;  %v284_v4 = vadd.f32 %v1588_v63, %v283_v16 }
 0x12c   :  { %1496 = vmatmul.msk.f32.gmra.mxu0 %vm244_vm1, %v288_v15  ;;  %583 = vmatpush.msra.mxu1 %v538_v37 }
 0x12d   :  { %1501 = vmatmul.msk.f32.gmra.mxu1 %vm126_vm0, %v1781_v3  ;;  %1505 = vmatmul.msk.f32.gmra.mxu2 %vm126_vm0, %v1781_v3  ;;  %v289_v17 = vmax.f32 %v284_v4, 0.0 }
 0x12e   :  { %584 = vmatpush.msra.mxu1 %v537_v39 }
 0x130   :  { %585 = vmatpush.msra.mxu1 %v536_v40 }
 0x132   :  { %586 = vmatpush.msra.mxu1 %v535_v41 }
 0x134   :  { %1497 = vmatmul.msk.f32.gmra.mxu0 %vm244_vm1, %v289_v17  ;;  %587 = vmatpush.msra.mxu1 %v534_v42 }
 0x136   :  { %588 = vmatpush.msra.mxu1 %v533_v43 }
 0x138   :  { %846 = vmatpush.msrb.mxu1 %v540_v31 }
 0x13a   :  { %847 = vmatpush.msrb.mxu1 %v539_v35 }
 0x13c   :  { %848 = vmatpush.msrb.mxu1 %v538_v37  ;;  %v1656_v37 = vmov 1  }
 0x13e   :  { %849 = vmatpush.msrb.mxu1 %v537_v39 }
 0x140   :  { %850 = vmatpush.msrb.mxu1 %v536_v40  ;;  %v1478_v40 = vadd.f32 -1.0, %v1805_v27 }
 0x142   :  { %851 = vmatpush.msrb.mxu1 %v535_v41 }
 0x144   :  { %852 = vmatpush.msrb.mxu1 %v534_v42 }
 0x146   :  { %853 = vmatpush.msrb.mxu1 %v533_v43  ;;  %v115_v43 = vmul.f32 1e+30, %v1478_v40 }
 0x191   :  { %v1815_v34 = vpop.f32.mrf.mxu0 }
 0x192   :  { %v385_v22 = vpop.f32.mrf.mxu1 }
 0x193   :  { %431 = vrot.lane.b32.xlu0 %v385_v22, %s1654_s1  ;;  %1510 = vmatmul.msk.f32.vlgmr.msra.gmra.mxu0 %vm94_vm4, %v385_v22 }
 0x199   :  { %v329_v38 = vpop.f32.mrf.mxu0 }
 0x19a   :  { %v388_v23 = vpop.f32.mrf.mxu1  ;;  %v330_v48 = vadd.f32 %v1589_v47, %v329_v38 }
 0x19b   :  { %433 = vrot.lane.b32.xlu0 %v388_v23, %s1654_s1  ;;  %1511 = vmatmul.msk.f32.gmra.mxu0 %vm94_vm4, %v388_v23 }
 0x19c   :  { %v341_v49 = vmax.f32 %v330_v48, 0.0  ;;  %v1479_v48 = vadd.f32 -1.0, %v1809_v32 }
 0x19e   :  { %v347_v55 = vmul.f32 %v1590_v50, %v341_v49 }
 0x1a0   :  { %v1819_v57 = vadd.f32 %v347_v55, %v1724_v20 }
 0x1a1   :  { %v332_v45 = vpop.f32.mrf.mxu0 }
 0x1a2   :  { %v1793_v25 = vpop.f32.mrf.mxu1  ;;  %v333_v56 = vadd.f32 %v1589_v47, %v332_v45 }
 0x1a3   :  { %435 = vrot.lane.b32.xlu1 %v1793_v25, %s1654_s1  ;;  %1512 = vmatmul.msk.f32.gmra.mxu0 %vm94_vm4, %v1793_v25 }
 0x1a4   :  { %v342_v58 = vmax.f32 %v333_v56, 0.0 }
 0x1a6   :  { %v348_v63 = vmul.f32 %v1590_v50, %v342_v58 }
 0x1a8   :  { %v1825_v2 = vadd.f32 %v348_v63, %v1732_v24 }
 0x1a9   :  { %v335_v46 = vpop.f32.mrf.mxu0 }
 0x1aa   :  { %v1798_v26 = vpop.f32.mrf.mxu1  ;;  %v336_v0 = vadd.f32 %v1589_v47, %v335_v46 }
 0x1ab   :  { %437 = vrot.lane.b32.xlu1 %v1798_v26, %s1654_s1  ;;  %1513 = vmatmul.msk.f32.gmra.mxu0 %vm94_vm4, %v1798_v26 }
 0x1ac   :  { %v343_v5 = vmax.f32 %v336_v0, 0.0 }
 0x1ae   :  { %v349_v8 = vmul.f32 %v1590_v50, %v343_v5 }
 0x1b0   :  { %v1832_v11 = vadd.f32 %v349_v8, %v1740_v28  ;;  %v1655_v28 = vmov 0  }
 0x1b1   :  { %v338_v53 = vpop.f32.mrf.mxu0  ;;  %1579 = vset.pattern.permute.xlu2 %v1655_v28  ;;  %1581 = vset.pattern.permute.xlu0 %v1655_v28 }
 0x1b2   :  { %v339_v9 = vadd.f32 %v1589_v47, %v338_v53  ;;  %1582 = vset.pattern.permute.xlu1 %v1655_v28 }
 0x1b3   :  { %1526 = vmatmul.msk.f32.vlgmr.msrb.gmra.mxu0 %vm94_vm4, %v385_v22 }
 0x1b4   :  { %v344_v12 = vmax.f32 %v339_v9, 0.0 }
 0x1b6   :  { %v350_v15 = vmul.f32 %v1590_v50, %v344_v12  ;;  %v87_v12 = vld [vmem:[#allocation2 + $0x290] sm:$0xff] }
 0x1b8   :  { %v1839_v4 = vadd.f32 %v350_v15, %v1748_v30 }
 0x1bb   :  { %1527 = vmatmul.msk.f32.gmra.mxu0 %vm94_vm4, %v388_v23 }
 0x1c3   :  { %1528 = vmatmul.msk.f32.gmra.mxu0 %vm94_vm4, %v1793_v25 }
 0x1cb   :  { %1529 = vmatmul.msk.f32.gmra.mxu0 %vm94_vm4, %v1798_v26 }
 0x205   :  { %v432_v51 = vpop.permute.xlu0 %431 }
 0x206   :  { %v443_v52 = vmul.f32 %v432_v51, %v385_v22 }
 0x208   :  { %1506 = vmatmul.msk.f32.vlgmr.msrb.gmra.mxu3 %vm94_vm4, %v443_v52  ;;  %v116_v52 = vmul.f32 1e+30, %v1479_v48 }
 0x20d   :  { %v434_v59 = vpop.permute.xlu0 %433 }
 0x20e   :  { %v444_v60 = vmul.f32 %v434_v59, %v388_v23 }
 0x210   :  { %1507 = vmatmul.msk.f32.gmra.mxu3 %vm94_vm4, %v444_v60  ;;  %v517_v61 = vpop.f32.mrf.mxu0 }
 0x211   :  { %v529_v1 = vmul.f32 %v517_v61, %v1819_v57  ;;  %v1480_v61 = vadd.f32 -1.0, %v1813_v33 }
 0x213   :  { %1514 = vmatmul.msk.f32.vlgmr.msra.gmra.mxu1 %vm244_vm1, %v529_v1  ;;  %v117_v1 = vmul.f32 1e+30, %v1480_v61 }
 0x215   :  { %v436_v6 = vpop.permute.xlu1 %435 }
 0x216   :  { %v445_v20 = vmul.f32 %v436_v6, %v1793_v25 }
 0x218   :  { %1508 = vmatmul.msk.f32.gmra.mxu3 %vm94_vm4, %v445_v20  ;;  %v520_v7 = vpop.f32.mrf.mxu0 }
 0x219   :  { %v530_v10 = vmul.f32 %v520_v7, %v1825_v2  ;;  %v1481_v7 = vadd.f32 -1.0, %v1815_v34 }
 0x21b   :  { %1515 = vmatmul.msk.f32.gmra.mxu1 %vm244_vm1, %v530_v10 }
 0x21d   :  { %v438_v13 = vpop.permute.xlu1 %437 }
 0x21e   :  { %v446_v24 = vmul.f32 %v438_v13, %v1798_v26 }
 0x220   :  { %1509 = vmatmul.msk.f32.gmra.mxu3 %vm94_vm4, %v446_v24  ;;  %v523_v14 = vpop.f32.mrf.mxu0  ;;  %v118_v24 = vmul.f32 1e+30, %v1481_v7 }
 0x221   :  { %v531_v16 = vmul.f32 %v523_v14, %v1832_v11 }
 0x223   :  { %1516 = vmatmul.msk.f32.gmra.mxu1 %vm244_vm1, %v531_v16  ;;  %v91_v16 = vmul.f32 %v87_v12, %v1809_v32 }
 0x228   :  { %v526_v17 = vpop.f32.mrf.mxu0 }
 0x229   :  { %v532_v18 = vmul.f32 %v526_v17, %v1839_v4 }
 0x22b   :  { %1517 = vmatmul.msk.f32.gmra.mxu1 %vm244_vm1, %v532_v18 }
 0x230   :  { %v794_v19 = vpop.f32.mrf.mxu0 }
 0x231   :  { %v806_v21 = vmul.f32 %v794_v19, %v1819_v57  ;;  %v98_v19 = vsel %vm94_vm4, %v91_v16, 0.0 }
 0x233   :  { %1530 = vmatmul.msk.f32.vlgmr.msrb.gmra.mxu1 %vm244_vm1, %v806_v21 }
 0x238   :  { %v797_v22 = vpop.f32.mrf.mxu0 }
 0x239   :  { %v807_v23 = vmul.f32 %v797_v22, %v1825_v2 }
 0x23b   :  { %1531 = vmatmul.msk.f32.gmra.mxu1 %vm244_vm1, %v807_v23 }
 0x240   :  { %v800_v30 = vpop.f32.mrf.mxu0 }
 0x241   :  { %v808_v25 = vmul.f32 %v800_v30, %v1832_v11 }
 0x243   :  { %1532 = vmatmul.msk.f32.gmra.mxu1 %vm244_vm1, %v808_v25 }
 0x248   :  { %v803_v26 = vpop.f32.mrf.mxu0 }
 0x249   :  { %v809_v29 = vmul.f32 %v803_v26, %v1839_v4 }
 0x24b   :  { %1533 = vmatmul.msk.f32.gmra.mxu1 %vm244_vm1, %v809_v29 }
 0x28b   :  { %v478_v31 = vpop.f32.mrf.mxu3 }
 0x28c   :  { %543 = vperm.xlu2 %1579, %v478_v31  }
 0x290   :  { %v590_v39 = vpop.f32.mrf.mxu1 }
 0x293   :  { %v481_v35 = vpop.f32.mrf.mxu3 }
 0x294   :  { %548 = vperm.xlu2 %1579, %v481_v35  }
 0x298   :  { %v593_v47 = vpop.f32.mrf.mxu1 }
 0x29b   :  { %v484_v36 = vpop.f32.mrf.mxu3 }
 0x29c   :  { %1580 = vset.pattern.permute.xlu2 %v1656_v37  ;;  %553 = vperm.xlu0 %1581, %v484_v36  }
 0x29d   :  { %811 = vperm.xlu2 %1580, %v478_v31  }
 0x2a0   :  { %v596_v58 = vpop.f32.mrf.mxu1 }
 0x2a3   :  { %v487_v38 = vpop.f32.mrf.mxu3 }
 0x2a4   :  { %1584 = vset.pattern.permute.xlu0 %v1656_v37  ;;  %558 = vperm.xlu1 %1582, %v487_v38  }
 0x2a5   :  { %819 = vperm.xlu0 %1584, %v484_v36  }
 0x2a8   :  { %v599_v59 = vpop.f32.mrf.mxu1 }
 0x2ac   :  { %1583 = vset.pattern.permute.xlu1 %v1656_v37 }
 0x2ad   :  { %823 = vperm.xlu0 %1584, %v487_v38   ;;  %815 = vperm.xlu1 %1583, %v481_v35  }
 0x2b0   :  { %v855_v60 = vpop.f32.mrf.mxu1 }
 0x2b8   :  { %v858_v20 = vpop.f32.mrf.mxu1 }
 0x2c0   :  { %v861_v22 = vpop.f32.mrf.mxu1 }
 0x2e6   :  { %v544_v41 = vpop.permute.xlu2 %543 }
 0x2e7   :  { %v591_v42 = vadd.f32 %v590_v39, %v544_v41  ;;  %v864_v39 = vpop.f32.mrf.mxu1 }
 0x2e9   :  { %v602_v45 = vmul.f32 0.35355338, %v591_v42 }
 0x2eb   :  { %v1852_v46 = vadd.f32 %v602_v45, %v115_v43 }
 0x2ed   :  { %v610_v49 = vsel %vm94_vm4, %v1852_v46, -inf }
 0x2ee   :  { %v549_v50 = vpop.permute.xlu2 %548  ;;  %611 = vmax.xlane.f32.xlu2 %v610_v49 }
 0x2ef   :  { %v594_v51 = vadd.f32 %v593_v47, %v549_v50 }
 0x2f1   :  { %v603_v53 = vmul.f32 0.35355338, %v594_v51 }
 0x2f3   :  { %v607_v55 = vadd.f32 %v603_v53, %v116_v52 }
 0x2f5   :  { %v613_v56 = vsel %vm94_vm4, %v607_v55, -inf }
 0x2f6   :  { %614 = vmax.xlane.f32.xlu1 %v613_v56 }
 0x2f7   :  { %v812_v9 = vpop.permute.xlu2 %811 }
 0x2f8   :  { %v856_v14 = vadd.f32 %v855_v60, %v812_v9 }
 0x2fa   :  { %v867_v28 = vmul.f32 0.35355338, %v856_v14 }
 0x2fc   :  { %v871_v26 = vadd.f32 %v867_v28, %v115_v43 }
 0x2fe   :  { %v875_v36 = vsel %vm94_vm4, %v871_v26, -inf }
 0x30e   :  { %v554_v63 = vpop.permute.xlu0 %553 }
 0x30f   :  { %v597_v0 = vadd.f32 %v596_v58, %v554_v63 }
 0x311   :  { %v604_v5 = vmul.f32 0.35355338, %v597_v0 }
 0x313   :  { %v1859_v6 = vadd.f32 %v604_v5, %v117_v1 }
 0x315   :  { %v616_v8 = vsel %vm94_vm4, %v1859_v6, -inf }
 0x316   :  { %v559_v10 = vpop.permute.xlu1 %558  ;;  %617 = vmax.xlane.f32.xlu0 %v616_v8 }
 0x317   :  { %v600_v13 = vadd.f32 %v599_v59, %v559_v10  ;;  %v820_v18 = vpop.permute.xlu0 %819  ;;  %v86_v59 = vld [vmem:[#allocation2 + $0x288] sm:$0xff] }
 0x318   :  { %v862_v25 = vadd.f32 %v861_v22, %v820_v18  ;;  %v90_v60 = vmul.f32 %v86_v59, %v1805_v27 }
 0x319   :  { %v605_v15 = vmul.f32 0.35355338, %v600_v13 }
 0x31a   :  { %v869_v35 = vmul.f32 0.35355338, %v862_v25  ;;  %v95_v63 = vsel %vm94_vm4, %v90_v60, 0.0 }
 0x31b   :  { %v609_v17 = vadd.f32 %v605_v15, %v118_v24 }
 0x31c   :  { %v873_v41 = vadd.f32 %v869_v35, %v117_v1 }
 0x31d   :  { %v619_v21 = vsel %vm94_vm4, %v609_v17, -inf }
 0x31e   :  { %99 = vadd.xlane.f32.xlu0 %v98_v19  ;;  %620 = vmax.xlane.f32.xlu2 %v619_v21  ;;  %v881_v45 = vsel %vm94_vm4, %v873_v41, -inf }
 0x31f   :  { %v816_v23 = vpop.permute.xlu1 %815  ;;  %v824_v37 = vpop.permute.xlu0 %823 }
 0x320   :  { %v859_v30 = vadd.f32 %v858_v20, %v816_v23  ;;  %v865_v40 = vadd.f32 %v864_v39, %v824_v37 }
 0x322   :  { %v868_v29 = vmul.f32 0.35355338, %v859_v30  ;;  %v870_v42 = vmul.f32 0.35355338, %v865_v40 }
 0x324   :  { %v872_v31 = vadd.f32 %v868_v29, %v116_v52  ;;  %v1870_v47 = vadd.f32 %v870_v42, %v118_v24  ;;  %v89_v24 = vld [vmem:[#allocation2 + $0x2a0] sm:$0xff] }
 0x325   :  { %v93_v15 = vmul.f32 %v89_v24, %v1815_v34  ;;  %v726_v24 = vld [vmem:[#allocation2 + $0x188] sm:$0xff] }
 0x326   :  { %876 = vmax.xlane.f32.xlu2 %v875_v36  ;;  %v878_v38 = vsel %vm94_vm4, %v872_v31, -inf  ;;  %v884_v43 = vsel %vm94_vm4, %v1870_v47, -inf }
 0x327   :  { %879 = vmax.xlane.f32.xlu1 %v878_v38  ;;  %v104_v22 = vsel %vm94_vm4, %v93_v15, 0.0 }
 0x32e   :  { %882 = vmax.xlane.f32.xlu2 %v881_v45  ;;  %v1915_v45 = vld [vmem:[#allocation2 + $0x158] sm:$0xff] }
 0x32f   :  { %702 = vmatpush.msra.mxu2 %v1915_v45 }
 0x336   :  { %885 = vmax.xlane.f32.xlu2 %v884_v43  ;;  %v1918_v43 = vld [vmem:[#allocation2 + $0x150] sm:$0xff] }
 0x337   :  { %703 = vmatpush.msra.mxu2 %v1918_v43 }
 0x339   :  { %965 = vmatpush.msrb.mxu2 %v1915_v45 }
 0x33b   :  { %966 = vmatpush.msrb.mxu2 %v1918_v43 }
 0x361   :  { %v612_v48 = vpop.xlane.xlu2 %611 }
 0x362   :  { %v622_v49 = vsub.f32 %v1852_v46, %v612_v48 }
 0x364   :  { %v626_v50 = vmul.f32 1.442695, %v622_v49 }
 0x366   :  { %1593 = vpow2.f32 %v626_v50 }
 0x369   :  { %v615_v51 = vpop.xlane.xlu1 %614 }
 0x36a   :  { %v623_v52 = vsub.f32 %v607_v55, %v615_v51  ;;  %v88_v55 = vld [vmem:[#allocation2 + $0x298] sm:$0xff] }
 0x36b   :  { %v92_v0 = vmul.f32 %v88_v55, %v1813_v33 }
 0x36c   :  { %v1875_v53 = vpop.eup %1593  ;;  %v628_v56 = vmul.f32 1.442695, %v623_v52 }
 0x36d   :  { %v634_v58 = vsel %vm94_vm4, %v1875_v53, 0.0  ;;  %v101_v1 = vsel %vm94_vm4, %v92_v0, 0.0 }
 0x36e   :  { %1595 = vpow2.f32 %v628_v56  ;;  %635 = vadd.xlane.f32.xlu1 %v634_v58 }
 0x374   :  { %v1880_v61 = vpop.eup %1595 }
 0x375   :  { %v637_v46 = vsel %vm94_vm4, %v1880_v61, 0.0 }
 0x376   :  { %96 = vadd.xlane.f32.xlu1 %v95_v63  ;;  %638 = vadd.xlane.f32.xlu2 %v637_v46 }
 0x37e   :  { %102 = vadd.xlane.f32.xlu2 %v101_v1 }
 0x389   :  { %v618_v5 = vpop.xlane.xlu0 %617 }
 0x38a   :  { %v624_v20 = vsub.f32 %v1859_v6, %v618_v5 }
 0x38c   :  { %v630_v7 = vmul.f32 1.442695, %v624_v20 }
 0x38e   :  { %1597 = vpow2.f32 %v630_v7 }
 0x391   :  { %v621_v8 = vpop.xlane.xlu2 %620  ;;  %v1931_v58 = vpop.xlane.xlu0 %99 }
 0x392   :  { %v625_v9 = vsub.f32 %v609_v17, %v621_v8  ;;  %v1936_v60 = vmul.f32 %v1931_v58, %v1809_v32 }
 0x394   :  { %v1888_v10 = vpop.eup %1597  ;;  %v632_v12 = vmul.f32 1.442695, %v625_v9 }
 0x395   :  { %v640_v13 = vsel %vm94_vm4, %v1888_v10, 0.0 }
 0x396   :  { %1599 = vpow2.f32 %v632_v12  ;;  %641 = vadd.xlane.f32.xlu1 %v640_v13  ;;  %v728_v12 = vld [vmem:[#allocation2 + $0x198] sm:$0xff]  ;;  %v727_v13 = vld [vmem:[#allocation2 + $0x190] sm:$0xff] }
 0x397   :  { %749 = vmatpush.msra.mxu3 %v728_v12 }
 0x399   :  { %v877_v14 = vpop.xlane.xlu2 %876  ;;  %750 = vmatpush.msra.mxu3 %v727_v13 }
 0x39a   :  { %v887_v16 = vsub.f32 %v871_v26, %v877_v14  ;;  %v880_v18 = vpop.xlane.xlu1 %879 }
 0x39b   :  { %v888_v28 = vsub.f32 %v872_v31, %v880_v18  ;;  %v725_v18 = vld [vmem:[#allocation2 + $0x180] sm:$0xff]  ;;  %751 = vmatpush.msra.mxu3 %v726_v24 }
 0x39c   :  { %v1893_v6 = vpop.eup %1599  ;;  %v891_v19 = vmul.f32 1.442695, %v887_v16 }
 0x39d   :  { %v893_v21 = vmul.f32 1.442695, %v888_v28  ;;  %v643_v17 = vsel %vm94_vm4, %v1893_v6, 0.0  ;;  %752 = vmatpush.msra.mxu3 %v725_v18 }
 0x39e   :  { %1601 = vpow2.f32 %v891_v19  ;;  %644 = vadd.xlane.f32.xlu0 %v643_v17  ;;  %105 = vadd.xlane.f32.xlu1 %v104_v22  ;;  %v724_v19 = vld [vmem:[#allocation2 + $0x178] sm:$0xff]  ;;  %v723_v22 = vld [vmem:[#allocation2 + $0x170] sm:$0xff] }
 0x39f   :  { %1603 = vpow2.f32 %v893_v21  ;;  %753 = vmatpush.msra.mxu3 %v724_v19 }
 0x3a1   :  { %v883_v23 = vpop.xlane.xlu2 %882  ;;  %754 = vmatpush.msra.mxu3 %v723_v22 }
 0x3a2   :  { %v889_v30 = vsub.f32 %v873_v41, %v883_v23 }
 0x3a4   :  { %v1898_v25 = vpop.eup %1601  ;;  %v895_v26 = vmul.f32 1.442695, %v889_v30 }
 0x3a5   :  { %v1900_v29 = vpop.eup %1603  ;;  %v899_v31 = vsel %vm94_vm4, %v1898_v25, 0.0 }
 0x3a6   :  { %1605 = vpow2.f32 %v895_v26  ;;  %900 = vadd.xlane.f32.xlu2 %v899_v31  ;;  %v902_v35 = vsel %vm94_vm4, %v1900_v29, 0.0 }
 0x3a7   :  { %903 = vadd.xlane.f32.xlu0 %v902_v35 }
 0x3a9   :  { %v886_v36 = vpop.xlane.xlu2 %885 }
 0x3aa   :  { %v890_v37 = vsub.f32 %v1870_v47, %v886_v36 }
 0x3ac   :  { %v1907_v38 = vpop.eup %1605  ;;  %v897_v39 = vmul.f32 1.442695, %v890_v37 }
 0x3ad   :  { %v905_v40 = vsel %vm94_vm4, %v1907_v38, 0.0 }
 0x3ae   :  { %1607 = vpow2.f32 %v897_v39  ;;  %906 = vadd.xlane.f32.xlu1 %v905_v40  ;;  %v722_v40 = vld [vmem:[#allocation2 + $0x168] sm:$0xff] }
 0x3af   :  { %755 = vmatpush.msra.mxu3 %v722_v40 }
 0x3b4   :  { %v1911_v41 = vpop.eup %1607 }
 0x3b5   :  { %v908_v42 = vsel %vm94_vm4, %v1911_v41, 0.0 }
 0x3b6   :  { %909 = vadd.xlane.f32.xlu2 %v908_v42  ;;  %v721_v42 = vld [vmem:[#allocation2 + $0x160] sm:$0xff] }
 0x3b7   :  { %756 = vmatpush.msra.mxu3 %v721_v42 }
 0x3e1   :  { %v636_v47 = vpop.xlane.xlu1 %635 }
 0x3e2   :  { %1609 = vrcp.f32 %v636_v47 }
 0x3e8   :  { %v1610_v48 = vpop.eup %1609 }
 0x3e9   :  { %v650_v49 = vmul.f32 %v1610_v48, %v1875_v53  ;;  %v1924_v50 = vpop.xlane.xlu1 %96  ;;  %v639_v51 = vpop.xlane.xlu2 %638 }
 0x3ea   :  { %v1928_v52 = vmul.f32 %v1924_v50, %v1805_v27  ;;  %1611 = vrcp.f32 %v639_v51 }
 0x3ec   :  { %v654_v56 = vmul.f32 %v650_v49, %v1928_v52 }
 0x3ee   :  { %1518 = vmatmul.msk.f32.vlgmr.msra.gmra.mxu2 %vm94_vm4, %v654_v56  ;;  %v658_v31 = vsel %vm94_vm4, %v654_v56, 0.0 }
 0x3f0   :  { %v1612_v59 = vpop.eup %1611 }
 0x3f1   :  { %v651_v53 = vmul.f32 %v1612_v59, %v1880_v61  ;;  %v1944_v46 = vpop.xlane.xlu2 %102 }
 0x3f2   :  { %v1948_v0 = vmul.f32 %v1944_v46, %v1813_v33 }
 0x3f3   :  { %v1940_v63 = vmul.f32 %v651_v53, %v1936_v60  ;;  %v991_v53 = vld [vmem:[#allocation2 + $0x1d8] sm:$0xff] }
 0x3f4   :  { %1012 = vmatpush.msrb.mxu3 %v991_v53 }
 0x3f6   :  { %1519 = vmatmul.msk.f32.gmra.mxu2 %vm94_vm4, %v1940_v63 }
 0x409   :  { %v642_v27 = vpop.xlane.xlu1 %641 }
 0x40a   :  { %1613 = vrcp.f32 %v642_v27  ;;  %v990_v27 = vld [vmem:[#allocation2 + $0x1d0] sm:$0xff] }
 0x40b   :  { %1013 = vmatpush.msrb.mxu3 %v990_v27 }
 0x410   :  { %v1614_v55 = vpop.eup %1613 }
 0x411   :  { %v645_v1 = vpop.xlane.xlu0 %644  ;;  %v652_v32 = vmul.f32 %v1614_v55, %v1888_v10  ;;  %v1956_v5 = vpop.xlane.xlu1 %105  ;;  %v989_v55 = vld [vmem:[#allocation2 + $0x1c8] sm:$0xff] }
 0x412   :  { %1615 = vrcp.f32 %v645_v1  ;;  %v1960_v7 = vmul.f32 %v1956_v5, %v1815_v34  ;;  %1014 = vmatpush.msrb.mxu3 %v989_v55  ;;  %v988_v1 = vld [vmem:[#allocation2 + $0x1c0] sm:$0xff] }
 0x413   :  { %v1952_v61 = vmul.f32 %v652_v32, %v1948_v0  ;;  %v987_v32 = vld [vmem:[#allocation2 + $0x1b8] sm:$0xff] }
 0x414   :  { %1015 = vmatpush.msrb.mxu3 %v988_v1 }
 0x415   :  { %1520 = vmatmul.msk.f32.gmra.mxu2 %vm94_vm4, %v1952_v61 }
 0x416   :  { %1016 = vmatpush.msrb.mxu3 %v987_v32 }
 0x418   :  { %v1616_v20 = vpop.eup %1615 }
 0x419   :  { %v901_v8 = vpop.xlane.xlu2 %900  ;;  %v653_v33 = vmul.f32 %v1616_v20, %v1893_v6  ;;  %v986_v20 = vld [vmem:[#allocation2 + $0x1b0] sm:$0xff] }
 0x41a   :  { %1617 = vrcp.f32 %v901_v8  ;;  %v904_v9 = vpop.xlane.xlu0 %903  ;;  %1017 = vmatpush.msrb.mxu3 %v986_v20  ;;  %v985_v8 = vld [vmem:[#allocation2 + $0x1a8] sm:$0xff] }
 0x41b   :  { %1619 = vrcp.f32 %v904_v9  ;;  %v1964_v10 = vmul.f32 %v653_v33, %v1960_v7  ;;  %v984_v33 = vld [vmem:[#allocation2 + $0x1a0] sm:$0xff] }
 0x41c   :  { %1018 = vmatpush.msrb.mxu3 %v985_v8  ;;  %v1053_v8 = vld [vmem:[#allocation2 + $0x1e8] sm:$0xff] }
 0x41d   :  { %1521 = vmatmul.msk.f32.gmra.mxu2 %vm94_vm4, %v1964_v10  ;;  %1089 = vmatpush.msra.mxu0 %v1053_v8  ;;  %v1201_v8 = vld [vmem:[#allocation2 + $0x228] sm:$0xff] }
 0x41e   :  { %1019 = vmatpush.msrb.mxu3 %v984_v33  ;;  %v661_v33 = vsel %vm94_vm4, %v1940_v63, 0.0 }
 0x420   :  { %v1618_v14 = vpop.eup %1617 }
 0x421   :  { %v1620_v34 = vpop.eup %1619  ;;  %v915_v15 = vmul.f32 %v1618_v14, %v1898_v25  ;;  %v907_v16 = vpop.xlane.xlu1 %906 }
 0x422   :  { %1621 = vrcp.f32 %v907_v16  ;;  %v916_v28 = vmul.f32 %v1620_v34, %v1900_v29 }
 0x423   :  { %v919_v6 = vmul.f32 %v915_v15, %v1928_v52 }
 0x424   :  { %v920_v21 = vmul.f32 %v916_v28, %v1936_v60 }
 0x425   :  { %1534 = vmatmul.msk.f32.vlgmr.msrb.gmra.mxu2 %vm94_vm4, %v919_v6  ;;  %v923_v17 = vsel %vm94_vm4, %v919_v6, 0.0 }
 0x426   :  { %924 = vadd.xlane.f32.xlu0 %v923_v17  ;;  %v926_v23 = vsel %vm94_vm4, %v920_v21, 0.0 }
 0x427   :  { %927 = vadd.xlane.f32.xlu2 %v926_v23 }
 0x428   :  { %v1622_v30 = vpop.eup %1621 }
 0x429   :  { %v917_v25 = vmul.f32 %v1622_v30, %v1907_v38  ;;  %v910_v26 = vpop.xlane.xlu2 %909  ;;  %v1987_v38 = vpop.f32.mrf.mxu2 }
 0x42a   :  { %1623 = vrcp.f32 %v910_v26 }
 0x42b   :  { %v921_v29 = vmul.f32 %v917_v25, %v1948_v0 }
 0x42d   :  { %1535 = vmatmul.msk.f32.gmra.mxu2 %vm94_vm4, %v920_v21  ;;  %v929_v35 = vsel %vm94_vm4, %v921_v29, 0.0  ;;  %v774_v21 = vld [vmem:[#allocation2 + $0x1e0] sm:$0xff] }
 0x42e   :  { %659 = vadd.xlane.f32.xlu0 %v658_v31  ;;  %1130 = vmatpush.msra.mxu1 %v774_v21 }
 0x42f   :  { %930 = vadd.xlane.f32.xlu2 %v929_v35 }
 0x430   :  { %v1624_v36 = vpop.eup %1623 }
 0x431   :  { %v918_v37 = vmul.f32 %v1624_v36, %v1911_v41  ;;  %v1989_v47 = vpop.f32.mrf.mxu2 }
 0x433   :  { %v1983_v39 = vmul.f32 %v918_v37, %v1960_v7 }
 0x435   :  { %1536 = vmatmul.msk.f32.gmra.mxu2 %vm94_vm4, %v921_v29  ;;  %v932_v42 = vsel %vm94_vm4, %v1983_v39, 0.0 }
 0x439   :  { %v1991_v48 = vpop.f32.mrf.mxu2 }
 0x43d   :  { %1537 = vmatmul.msk.f32.gmra.mxu2 %vm94_vm4, %v1983_v39 }
 0x441   :  { %v1993_v49 = vpop.f32.mrf.mxu2 }
 0x471   :  { %v705_v51 = vpop.f32.mrf.mxu2 }
 0x472   :  { %v717_v41 = vmul.f32 %v705_v51, %v1819_v57  ;;  %v664_v51 = vsel %vm94_vm4, %v1952_v61, 0.0 }
 0x474   :  { %1522 = vmatmul.msk.f32.vlgmr.msra.gmra.mxu3 %vm244_vm1, %v717_v41 }
 0x479   :  { %v708_v56 = vpop.f32.mrf.mxu2 }
 0x47a   :  { %v718_v59 = vmul.f32 %v708_v56, %v1825_v2 }
 0x47c   :  { %1523 = vmatmul.msk.f32.gmra.mxu3 %vm244_vm1, %v718_v59 }
 0x498   :  { %v711_v9 = vpop.f32.mrf.mxu2 }
 0x499   :  { %v719_v12 = vmul.f32 %v711_v9, %v1832_v11  ;;  %v925_v17 = vpop.xlane.xlu0 %924  ;;  %v667_v9 = vsel %vm94_vm4, %v1964_v10, 0.0 }
 0x49a   :  { %v928_v41 = vpop.xlane.xlu2 %927  ;;  %v935_v55 = vmul.f32 %v925_v17, %v1987_v38 }
 0x49b   :  { %1524 = vmatmul.msk.f32.gmra.mxu3 %vm244_vm1, %v719_v12  ;;  %v936_v39 = vmul.f32 %v928_v41, %v1989_v47 }
 0x4a0   :  { %v714_v13 = vpop.f32.mrf.mxu2 }
 0x4a1   :  { %v720_v24 = vmul.f32 %v714_v13, %v1839_v4  ;;  %v660_v22 = vpop.xlane.xlu0 %659 }
 0x4a2   :  { %v670_v23 = vmul.f32 %v660_v22, %v1987_v38  ;;  %v931_v56 = vpop.xlane.xlu2 %930 }
 0x4a3   :  { %1525 = vmatmul.msk.f32.gmra.mxu3 %vm244_vm1, %v720_v24  ;;  %v937_v59 = vmul.f32 %v931_v56, %v1991_v48 }
 0x4a8   :  { %v968_v14 = vpop.f32.mrf.mxu2 }
 0x4a9   :  { %v980_v34 = vmul.f32 %v968_v14, %v1819_v57 }
 0x4ab   :  { %1538 = vmatmul.msk.f32.vlgmr.msrb.gmra.mxu3 %vm244_vm1, %v980_v34 }
 0x4b0   :  { %v971_v15 = vpop.f32.mrf.mxu2 }
 0x4b1   :  { %v981_v16 = vmul.f32 %v971_v15, %v1825_v2 }
 0x4b3   :  { %1539 = vmatmul.msk.f32.gmra.mxu3 %vm244_vm1, %v981_v16 }
 0x4b8   :  { %v974_v18 = vpop.f32.mrf.mxu2 }
 0x4b9   :  { %v982_v28 = vmul.f32 %v974_v18, %v1832_v11 }
 0x4bb   :  { %1540 = vmatmul.msk.f32.gmra.mxu3 %vm244_vm1, %v982_v28 }
 0x4c0   :  { %v977_v6 = vpop.f32.mrf.mxu2 }
 0x4c1   :  { %v983_v19 = vmul.f32 %v977_v6, %v1839_v4 }
 0x4c3   :  { %1541 = vmatmul.msk.f32.gmra.mxu3 %vm244_vm1, %v983_v19 }
 0x4f7   :  { %v758_v30 = vpop.f32.mrf.mxu3 }
 0x4f8   :  { %v770_v25 = vadd.f32 %v758_v30, %v670_v23  ;;  %v1158_v23 = vld [vmem:[#allocation2 + $0x1f8] sm:$0xff] }
 0x4f9   :  { %1186 = vmatpush.msra.mxu2 %v1158_v23 }
 0x4fa   :  { %1546 = vmatmul.msk.f32.vlgmr.msra.gmra.mxu1 %vm126_vm0, %v770_v25 }
 0x4fb   :  { %1431 = vmatpush.msrb.mxu2 %v1915_v45 }
 0x4fd   :  { %1432 = vmatpush.msrb.mxu2 %v1918_v43 }
 0x4ff   :  { %v761_v26 = vpop.f32.mrf.mxu3 }
 0x51e   :  { %v764_v29 = vpop.f32.mrf.mxu3 }
 0x526   :  { %v767_v31 = vpop.f32.mrf.mxu3 }
 0x52e   :  { %v1021_v35 = vpop.f32.mrf.mxu3 }
 0x52f   :  { %1037 = vrot.lane.b32.xlu1 %v1021_v35, %s1653_s24 }
 0x536   :  { %v1024_v36 = vpop.f32.mrf.mxu3 }
 0x537   :  { %1039 = vrot.lane.b32.xlu0 %v1024_v36, %s1653_s24 }
 0x53e   :  { %v1027_v37 = vpop.f32.mrf.mxu3 }
 0x53f   :  { %1041 = vrot.lane.b32.xlu2 %v1027_v37, %s1653_s24 }
 0x546   :  { %v1030_v40 = vpop.f32.mrf.mxu3 }
 0x547   :  { %1043 = vrot.lane.b32.xlu0 %v1030_v40, %s1653_s24 }
 0x559   :  { %933 = vadd.xlane.f32.xlu1 %v932_v42 }
 0x571   :  { %665 = vadd.xlane.f32.xlu0 %v664_v51 }
 0x599   :  { %v1042_v53 = vpop.permute.xlu2 %1041 }
 0x59a   :  { %v1051_v27 = vadd.f32 %v1042_v53, %v937_v59 }
 0x59c   :  { %1062 = vrot.lane.b32.xlu0 %v1051_v27, %s1657_s2 }
 0x5a1   :  { %v1038_v1 = vpop.permute.xlu1 %1037 }
 0x5a2   :  { %v1049_v32 = vadd.f32 %v1038_v1, %v935_v55 }
 0x5a4   :  { %1058 = vrot.lane.b32.xlu2 %v1049_v32, %s1657_s2 }
 0x5a9   :  { %v1040_v20 = vpop.permute.xlu0 %1039 }
 0x5aa   :  { %v1050_v61 = vadd.f32 %v1040_v20, %v936_v39  ;;  %v1203_v39 = vld [vmem:[#allocation2 + $0x238] sm:$0xff] }
 0x5ac   :  { %1060 = vrot.lane.b32.xlu1 %v1050_v61, %s1657_s2 }
 0x5b9   :  { %v1044_v13 = vpop.permute.xlu0 %1043 }
 0x5cc   :  { %v934_v38 = vpop.xlane.xlu1 %933 }
 0x5cd   :  { %662 = vadd.xlane.f32.xlu2 %v661_v33  ;;  %v938_v12 = vmul.f32 %v934_v38, %v1993_v49  ;;  %v1241_v38 = vld [vmem:[#allocation2 + $0xd8] sm:$0xff] }
 0x5cf   :  { %v1052_v24 = vadd.f32 %v1044_v13, %v938_v12  ;;  %v1208_v12 = vld [vmem:[#allocation2 + $0x240] sm:$0x3]  ;;  %v1240_v13 = vld [vmem:[#allocation2 + $0xd0] sm:$0xff] }
 0x5d6   :  { %668 = vadd.xlane.f32.xlu1 %v667_v9 }
 0x5e4   :  { %v666_v34 = vpop.xlane.xlu0 %665 }
 0x5e5   :  { %1064 = vrot.lane.b32.xlu2 %v1052_v24, %s1657_s2  ;;  %v672_v28 = vmul.f32 %v666_v34, %v1991_v48  ;;  %v1132_v48 = vpop.f32.mrf.mxu1  ;;  %v1239_v24 = vld [vmem:[#allocation2 + $0xc8] sm:$0xff]  ;;  %v1237_v34 = vld [vmem:[#allocation2 + $0xb8] sm:$0xff] }
 0x5e7   :  { %v772_v19 = vadd.f32 %v764_v29, %v672_v28 }
 0x5fe   :  { %v1059_v14 = vpop.permute.xlu2 %1058 }
 0x5ff   :  { %1542 = vmatmul.msk.f32.vlgmr.msra.gmra.mxu0 %vm126_vm0, %v1059_v14  ;;  %v1238_v14 = vld [vmem:[#allocation2 + $0xc0] sm:$0xff] }
 0x60e   :  { %v1063_v63 = vpop.permute.xlu0 %1062 }
 0x61e   :  { %v1061_v15 = vpop.permute.xlu1 %1060 }
 0x61f   :  { %1543 = vmatmul.msk.f32.gmra.mxu0 %vm126_vm0, %v1061_v15  ;;  %v1236_v15 = vld [vmem:[#allocation2 + $0xb0] sm:$0xff] }
 0x627   :  { %1544 = vmatmul.msk.f32.gmra.mxu0 %vm126_vm0, %v1063_v63  ;;  %v1235_v63 = vld [vmem:[#allocation2 + $0xa8] sm:$0xff] }
 0x640   :  { %v663_v16 = vpop.xlane.xlu2 %662 }
 0x641   :  { %v671_v10 = vmul.f32 %v663_v16, %v1989_v47  ;;  %v1591_v47 = vld [vmem:[#allocation2 + $0x2ab] ss:$0 sm:$0xff]  ;;  %v1234_v16 = vld [vmem:[#allocation2 + $0xa0] sm:$0xff] }
 0x643   :  { %v771_v18 = vadd.f32 %v761_v26, %v671_v10 }
 0x645   :  { %1547 = vmatmul.msk.f32.gmra.mxu1 %vm126_vm0, %v771_v18 }
 0x648   :  { %v1065_v6 = vpop.permute.xlu2 %1064 }
 0x649   :  { %1545 = vmatmul.msk.f32.gmra.mxu0 %vm126_vm0, %v1065_v6  ;;  %v669_v21 = vpop.xlane.xlu1 %668  ;;  %v1345_v6 = vld [vmem:[#allocation2 + $0x218] sm:$0xff] }
 0x64a   :  { %v673_v17 = vmul.f32 %v669_v21, %v1993_v49 }
 0x64c   :  { %v773_v22 = vadd.f32 %v767_v31, %v673_v17 }
 0x64d   :  { %1548 = vmatmul.msk.f32.gmra.mxu1 %vm126_vm0, %v772_v19  ;;  %v1344_v19 = vld [vmem:[#allocation2 + $0x210] sm:$0xff] }
 0x655   :  { %1549 = vmatmul.msk.f32.gmra.mxu1 %vm126_vm0, %v773_v22  ;;  %v1343_v22 = vld [vmem:[#allocation2 + $0x208] sm:$0xff] }
 0x67c   :  { %v1091_v30 = vpop.f32.mrf.mxu0 }
 0x67d   :  { %v1133_v25 = vadd.f32 %v1132_v48, %v1091_v30 }
 0x67f   :  { %v1146_v26 = vmul.f32 %v1591_v47, %v1133_v25  ;;  %1288 = vrot.lane.b32.xlu0 %v1133_v25, %s1657_s2  ;;  %v1338_v25 = vld [vmem:[#allocation2 + $0x248] sm:$0xff] }
 0x681   :  { %v1150_v29 = vadd.f32 %v1146_v26, %v1757_v44  ;;  %v1283_v44 = vld [vmem:[#allocation2 + $0x1f0] sm:$0xf] }
 0x682   :  { %1559 = vmatpush.msk.msrb.mxu0 %vm1305_vm5, %v1283_v44  ;;  %v1339_v26 = vld [vmem:[#allocation2 + $0x250] sm:$0xff] }
 0x683   :  { %v1154_v49 = vmul.f32 %v1150_v29, %v1924_v50  ;;  %v1340_v29 = vld [vmem:[#allocation2 + $0x258] sm:$0xff] }
 0x685   :  { %1550 = vmatmul.msk.f32.vlgmr.msra.gmra.mxu2 %vm126_vm0, %v1154_v49  ;;  %v1341_v49 = vld [vmem:[#allocation2 + $0x260] sm:$0xff] }
 0x69c   :  { %v1094_v31 = vpop.f32.mrf.mxu0 }
 0x6a4   :  { %v1097_v40 = vpop.f32.mrf.mxu0 }
 0x6c2   :  { %v1135_v35 = vpop.f32.mrf.mxu1 }
 0x6c3   :  { %v1136_v36 = vadd.f32 %v1135_v35, %v1094_v31 }
 0x6c5   :  { %v1147_v37 = vmul.f32 %v1591_v47, %v1136_v36  ;;  %1290 = vrot.lane.b32.xlu0 %v1136_v36, %s1657_s2 }
 0x6c6   :  { %v1100_v59 = vpop.f32.mrf.mxu0 }
 0x6c7   :  { %v1151_v45 = vadd.f32 %v1147_v37, %v1765_v54 }
 0x6c9   :  { %v1155_v43 = vmul.f32 %v1151_v45, %v1931_v58 }
 0x6ca   :  { %v1138_v42 = vpop.f32.mrf.mxu1 }
 0x6cb   :  { %v1139_v51 = vadd.f32 %v1138_v42, %v1097_v40  ;;  %1551 = vmatmul.msk.f32.gmra.mxu2 %vm126_vm0, %v1155_v43  ;;  %v1592_v43 = vld [vmem:[#allocation2 + $0x2af] ss:$0 sm:$0xff] }
 0x6cd   :  { %v1148_v50 = vmul.f32 %v1591_v47, %v1139_v51  ;;  %1292 = vrot.lane.b32.xlu2 %v1139_v51, %s1657_s2 }
 0x6cf   :  { %v1152_v41 = vadd.f32 %v1148_v50, %v1773_v62 }
 0x6d1   :  { %v1156_v56 = vmul.f32 %v1152_v41, %v1944_v46 }
 0x6d2   :  { %v1141_v53 = vpop.f32.mrf.mxu1 }
 0x6d3   :  { %v1142_v54 = vadd.f32 %v1141_v53, %v1100_v59  ;;  %1552 = vmatmul.msk.f32.gmra.mxu2 %vm126_vm0, %v1156_v56 }
 0x6d5   :  { %v1149_v58 = vmul.f32 %v1591_v47, %v1142_v54  ;;  %1294 = vrot.lane.b32.xlu0 %v1142_v54, %s1657_s2  ;;  %v1342_v47 = vld [vmem:[#allocation2 + $0x200] sm:$0xff] }
 0x6d7   :  { %v1153_v27 = vadd.f32 %v1149_v58, %v1781_v3 }
 0x6d9   :  { %v1157_v55 = vmul.f32 %v1153_v27, %v1956_v5 }
 0x6db   :  { %1553 = vmatmul.msk.f32.gmra.mxu2 %vm126_vm0, %v1157_v55 }
 0x6e3   :  { %1568 = vmatmul.msk.f32.vlgmr.msrb.gmra.mxu2 %vm94_vm4, %v1928_v52 }
 0x6eb   :  { %1569 = vmatmul.msk.f32.gmra.mxu2 %vm94_vm4, %v1936_v60  ;;  %v1202_v60 = vld [vmem:[#allocation2 + $0x230] sm:$0xff] }
 0x6f1   :  { %v1289_v62 = vpop.permute.xlu0 %1288 }
 0x6f2   :  { %1560 = vmatmul.msk.f32.vlgmr.msrb.gmra.mxu0 %vm1296_vm6, %v1289_v62 }
 0x6f3   :  { %1570 = vmatmul.msk.f32.gmra.mxu2 %vm94_vm4, %v1948_v0  ;;  %v1200_v0 = vld [vmem:[#allocation2 + $0x220] sm:$0xff] }
 0x6fb   :  { %1571 = vmatmul.msk.f32.gmra.mxu2 %vm94_vm4, %v1960_v7 }
 0x708   :  { %v1188_v5 = vpop.f32.mrf.mxu2 }
 0x709   :  { %v1204_v7 = vmul.f32 %v1200_v0, %v1188_v5 }
 0x727   :  { %v1293_v46 = vpop.permute.xlu2 %1292 }
 0x737   :  { %v1291_v3 = vpop.permute.xlu0 %1290 }
 0x738   :  { %1561 = vmatmul.msk.f32.gmra.mxu0 %vm1296_vm6, %v1291_v3 }
 0x740   :  { %1562 = vmatmul.msk.f32.gmra.mxu0 %vm1296_vm6, %v1293_v46 }
 0x747   :  { %v1295_v1 = vpop.permute.xlu0 %1294 }
 0x748   :  { %1563 = vmatmul.msk.f32.gmra.mxu0 %vm1296_vm6, %v1295_v1 }
 0x74e   :  { %v1191_v52 = vpop.f32.mrf.mxu2 }
 0x74f   :  { %v1205_v9 = vmul.f32 %v1201_v8, %v1191_v52 }
 0x756   :  { %v1194_v32 = vpop.f32.mrf.mxu2 }
 0x757   :  { %v1206_v33 = vmul.f32 %v1202_v60, %v1194_v32 }
 0x75e   :  { %v1197_v20 = vpop.f32.mrf.mxu2 }
 0x75f   :  { %v1207_v61 = vmul.f32 %v1203_v39, %v1197_v20 }
 0x761   :  { %1225 = vmatpush.msra.mxu3 %v1207_v61 }
 0x763   :  { %1226 = vmatpush.msra.mxu3 %v1206_v33 }
 0x765   :  { %1227 = vmatpush.msra.mxu3 %v1205_v9 }
 0x766   :  { %v1434_v40 = vpop.f32.mrf.mxu2 }
 0x767   :  { %1228 = vmatpush.msra.mxu3 %v1204_v7 }
 0x768   :  { %1554 = vmatmul.msk.f32.vlgmr.msra.gmra.mxu3 %vm1209_vm7, %v1208_v12 }
 0x769   :  { %1262 = vmatpush.msrb.mxu3 %v1241_v38 }
 0x76b   :  { %1263 = vmatpush.msrb.mxu3 %v1240_v13 }
 0x76d   :  { %1264 = vmatpush.msrb.mxu3 %v1239_v24 }
 0x76e   :  { %v1437_v58 = vpop.f32.mrf.mxu2 }
 0x76f   :  { %1265 = vmatpush.msrb.mxu3 %v1238_v14  ;;  %v1326_v10 = vpop.f32.mrf.mxu0 }
 0x770   :  { %v1346_v30 = vmul.f32 %v1342_v47, %v1326_v10 }
 0x771   :  { %1266 = vmatpush.msrb.mxu3 %v1237_v34 }
 0x773   :  { %1267 = vmatpush.msrb.mxu3 %v1236_v15 }
 0x775   :  { %1268 = vmatpush.msrb.mxu3 %v1235_v63 }
 0x776   :  { %v1440_v32 = vpop.f32.mrf.mxu2 }
 0x777   :  { %1269 = vmatpush.msrb.mxu3 %v1234_v16 }
 0x778   :  { %1555 = vmatmul.msk.f32.vlgmr.msrb.gmra.mxu3 %vm244_vm1, %v1819_v57 }
 0x77e   :  { %v1443_v7 = vpop.f32.mrf.mxu2 }
 0x780   :  { %1556 = vmatmul.msk.f32.gmra.mxu3 %vm244_vm1, %v1825_v2 }
 0x788   :  { %1557 = vmatmul.msk.f32.gmra.mxu3 %vm244_vm1, %v1832_v11 }
 0x790   :  { %1558 = vmatmul.msk.f32.gmra.mxu3 %vm244_vm1, %v1839_v4 }
 0x7b5   :  { %v1329_v18 = vpop.f32.mrf.mxu0 }
 0x7b6   :  { %v1347_v48 = vmul.f32 %v1343_v22, %v1329_v18 }
 0x7bd   :  { %v1332_v28 = vpop.f32.mrf.mxu0 }
 0x7be   :  { %v1348_v23 = vmul.f32 %v1344_v19, %v1332_v28 }
 0x7c5   :  { %v1335_v21 = vpop.f32.mrf.mxu0 }
 0x7c6   :  { %v1349_v17 = vmul.f32 %v1345_v6, %v1335_v21 }
 0x7c8   :  { %1374 = vmatpush.msrb.mxu1 %v1349_v17 }
 0x7ca   :  { %1375 = vmatpush.msrb.mxu1 %v1348_v23 }
 0x7cc   :  { %1376 = vmatpush.msrb.mxu1 %v1347_v48 }
 0x7ce   :  { %1377 = vmatpush.msrb.mxu1 %v1346_v30 }
 0x7cf   :  { %1564 = vmatmul.msk.f32.vlgmr.msrb.gmra.mxu1 %vm1209_vm7, %v1338_v25 }
 0x7d7   :  { %1565 = vmatmul.msk.f32.gmra.mxu1 %vm1209_vm7, %v1339_v26 }
 0x7df   :  { %1566 = vmatmul.msk.f32.gmra.mxu1 %vm1209_vm7, %v1340_v29 }
 0x7e7   :  { %1567 = vmatmul.msk.f32.gmra.mxu1 %vm1209_vm7, %v1341_v49 }
 0x7eb   :  { %v1230_v31 = vpop.f32.mrf.mxu3 }
 0x7ec   :  { %1233 = vst [vmem:[%s2109_s4] sm:$0x3] %v1230_v31 }
 0x7fb   :  { %v1271_v35 = vpop.f32.mrf.mxu3 }
 0x803   :  { %v1274_v44 = vpop.f32.mrf.mxu3 }
 0x80b   :  { %v1277_v46 = vpop.f32.mrf.mxu3 }
 0x813   :  { %v1280_v33 = vpop.f32.mrf.mxu3 }
 0x84c   :  { %v1379_v36 = vpop.f32.mrf.mxu1 }
 0x84d   :  { %v1391_v37 = vadd.f32 %v1379_v36, %v1326_v10 }
 0x84f   :  { %v1395_v45 = vmul.f32 0.5, %v1391_v37 }
 0x851   :  { %v1399_v42 = vadd.f32 %v1395_v45, %v1271_v35 }
 0x853   :  { %v1448_v51 = vmul.f32 %v1592_v43, %v1399_v42 }
 0x854   :  { %v1382_v50 = vpop.f32.mrf.mxu1 }
 0x855   :  { %v1452_v41 = vadd.f32 %v1448_v51, %v1819_v57  ;;  %v1392_v56 = vadd.f32 %v1382_v50, %v1329_v18 }
 0x857   :  { %v1456_v59 = vmul.f32 %v1452_v41, %v1434_v40  ;;  %v1396_v53 = vmul.f32 0.5, %v1392_v56 }
 0x859   :  { %1460 = vst.msk [vmem:[%s2110_s5] sm:$0xff] %vm244_vm1, %v1456_v59  ;;  %v1400_v54 = vadd.f32 %v1396_v53, %v1274_v44 }
 0x85b   :  { %v1449_v27 = vmul.f32 %v1592_v43, %v1400_v54 }
 0x85c   :  { %v1385_v55 = vpop.f32.mrf.mxu1 }
 0x85d   :  { %v1453_v62 = vadd.f32 %v1449_v27, %v1825_v2  ;;  %v1393_v3 = vadd.f32 %v1385_v55, %v1332_v28 }
 0x85f   :  { %v1457_v5 = vmul.f32 %v1453_v62, %v1437_v58  ;;  %v1397_v1 = vmul.f32 0.5, %v1393_v3 }
 0x861   :  { %1461 = vst.msk [vmem:[%s2110_s5 + $0x8] sm:$0xff] %vm244_vm1, %v1457_v5  ;;  %v1401_v57 = vadd.f32 %v1397_v1, %v1277_v46 }
 0x863   :  { %v1450_v52 = vmul.f32 %v1592_v43, %v1401_v57 }
 0x864   :  { %v1388_v39 = vpop.f32.mrf.mxu1 }
 0x865   :  { %v1454_v60 = vadd.f32 %v1450_v52, %v1832_v11  ;;  %v1394_v20 = vadd.f32 %v1388_v39, %v1335_v21 }
 0x867   :  { %v1458_v61 = vmul.f32 %v1454_v60, %v1440_v32  ;;  %v1398_v8 = vmul.f32 0.5, %v1394_v20 }
 0x869   :  { %1462 = vst.msk [vmem:[%s2110_s5 + $0x10] sm:$0xff] %vm244_vm1, %v1458_v61  ;;  %v1402_v2 = vadd.f32 %v1398_v8, %v1280_v33 }
 0x86b   :  { %v1451_v0 = vmul.f32 %v1592_v43, %v1402_v2 }
 0x86d   :  { %v1455_v9 = vadd.f32 %v1451_v0, %v1839_v4 }
 0x86f   :  { %v1459_v38 = vmul.f32 %v1455_v9, %v1443_v7 }
 0x871   :  { %1463 = vst.msk [vmem:[%s2110_s5 + $0x18] sm:$0xff] %vm244_vm1, %v1459_v38 }
 0x872   :  { %1472 = vsyncpa [#allocation3], 1 }

</bundles_post_ra>
